<compile_context>
chip_gen: v7x
topology: tpu7x:2x2x1
jax: 0.10.0
libtpu: 0.0.40
codegen_flags: <defaults>
</compile_context>

<pallas_src>
import functools

import jax
import jax.numpy as jnp
from jax.experimental import pallas as pl
from jax.experimental.pallas import tpu as pltpu


# ---- model dimensions -------------------------------------------------------
IN_DIM = 28 * 28            # 784
H1, H2, OUT_DIM = 512, 256, 10
K_PAD = 896                 # 7 * 128 : lane-aligned contraction dim for fc1
OUT_PAD = 128               # lane-dense padded logits width (>= OUT_DIM)

DROP_P = 0.2
KEEP_SCALE = 1.0 / (1.0 - DROP_P)
# keep element iff uint32 bits >= KEEP_THR  =>  P(keep) = 1 - DROP_P
KEEP_THR = int(DROP_P * (1 << 32)) & 0xFFFFFFFF   # 858993459


def _round_up(n, m):
    return (n + m - 1) // m * m


# ---- kernel -----------------------------------------------------------------
def _mlp_kernel(*refs, dropout):
    """Fused fc1+ReLU(+drop) -> fc2+ReLU(+drop) -> fc3 on one batch tile."""
    if dropout:
        (x_ref, w1_ref, b1_ref, w2_ref, b2_ref, w3_ref, b3_ref,
         bits1_ref, bits2_ref, o_ref) = refs
    else:
        (x_ref, w1_ref, b1_ref, w2_ref, b2_ref, w3_ref, b3_ref, o_ref) = refs
        bits1_ref = bits2_ref = None

    def drop(h, bits_ref):
        if not dropout:
            return h
        # TODO(synk): dropout bits come from host-side jax.random (matches
        # torch Dropout in distribution, not bit-for-bit RNG stream);
        # in-kernel pltpu.prng_seed is not available in the interpret sandbox.
        keep = bits_ref[...] >= jnp.uint32(KEEP_THR)
        return jnp.where(keep, h * KEEP_SCALE, 0.0)

    # fc1 + ReLU (+ dropout1): bf16 operands, f32 MXU accumulation.
    h1 = jnp.dot(x_ref[...], w1_ref[...],
                 preferred_element_type=jnp.float32) + b1_ref[...]
    h1 = drop(jnp.maximum(h1, 0.0), bits1_ref)

    # fc2 + ReLU (+ dropout2)
    h2 = jnp.dot(h1.astype(jnp.bfloat16), w2_ref[...],
                 preferred_element_type=jnp.float32) + b2_ref[...]
    h2 = drop(jnp.maximum(h2, 0.0), bits2_ref)

    # fc3 -> lane-dense (TM, 128) padded logits slab (cols >= 10 are zero).
    o_ref[...] = (jnp.dot(h2.astype(jnp.bfloat16), w3_ref[...],
                          preferred_element_type=jnp.float32)
                  + b3_ref[...]).astype(o_ref.dtype)


# ---- parameter prep ---------------------------------------------------------
def init_params(key):
    """Torch-like init (U(-k, k), k = 1/sqrt(fan_in)); weights stored (in, out)."""
    def linear(key, fan_in, fan_out):
        kw, kb = jax.random.split(key)
        bound = 1.0 / (fan_in ** 0.5)
        w = jax.random.uniform(kw, (fan_in, fan_out), jnp.float32, -bound, bound)
        b = jax.random.uniform(kb, (1, fan_out), jnp.float32, -bound, bound)
        return w, b

    k1, k2, k3 = jax.random.split(key, 3)
    w1, b1 = linear(k1, IN_DIM, H1)
    w2, b2 = linear(k2, H1, H2)
    w3, b3 = linear(k3, H2, OUT_DIM)
    return (w1, b1, w2, b2, w3, b3)


def prepare_params(params):
    """Cast weights to bf16; zero-pad fc1 in-dim to 896 and fc3 out-dim to 128."""
    w1, b1, w2, b2, w3, b3 = params
    w1p = jnp.zeros((K_PAD, H1), jnp.bfloat16).at[:IN_DIM, :].set(
        w1.astype(jnp.bfloat16))
    w3p = jnp.zeros((H2, OUT_PAD), jnp.bfloat16).at[:, :OUT_DIM].set(
        w3.astype(jnp.bfloat16))
    b3p = jnp.zeros((1, OUT_PAD), jnp.float32).at[:, :OUT_DIM].set(
        b3.astype(jnp.float32))
    return (w1p, b1.astype(jnp.float32),
            w2.astype(jnp.bfloat16), b2.astype(jnp.float32),
            w3p, b3p)


# ---- wrapper ----------------------------------------------------------------
def simple_dnn_forward(x, prepared_params, *, dropout=True, seed=0):
    """x: (B, 1, 28, 28) or (B, 784) float32. Returns (B, 10) float32 logits."""
    w1, b1, w2, b2, w3, b3 = prepared_params
    bsz = x.shape[0]
    x2 = x.reshape(bsz, IN_DIM).astype(jnp.float32)

    # Batch tile: multiple of 8 sublanes; 256 rows once batches are large
    # (fills the v6e MXU; multiple of 128 for v5e; small VMEM footprint on v7x).
    tm = 256 if bsz >= 256 else _round_up(bsz, 8)
    bp = _round_up(bsz, tm)
    n_blocks = bp // tm

    # Pad batch to a tile multiple and K to 7*128, cast activations to bf16.
    xp = jnp.zeros((bp, K_PAD), jnp.float32).at[:bsz, :IN_DIM].set(x2)
    xp = xp.astype(jnp.bfloat16)

    in_arrays = [xp, w1, b1, w2, b2, w3, b3]
    in_specs = [
        pl.BlockSpec((tm, K_PAD), lambda i: (i, 0)),      # x tile (pipelined)
        pl.BlockSpec((K_PAD, H1), lambda i: (0, 0)),      # w1 (VMEM-resident)
        pl.BlockSpec((1, H1), lambda i: (0, 0)),          # b1
        pl.BlockSpec((H1, H2), lambda i: (0, 0)),         # w2
        pl.BlockSpec((1, H2), lambda i: (0, 0)),          # b2
        pl.BlockSpec((H2, OUT_PAD), lambda i: (0, 0)),    # w3 (lane-padded)
        pl.BlockSpec((1, OUT_PAD), lambda i: (0, 0)),     # b3 (lane-padded)
    ]

    if dropout:
        kb1, kb2 = jax.random.split(jax.random.PRNGKey(seed))
        bits1 = jax.random.bits(kb1, (bp, H1), jnp.uint32)
        bits2 = jax.random.bits(kb2, (bp, H2), jnp.uint32)
        in_arrays += [bits1, bits2]
        in_specs += [pl.BlockSpec((tm, H1), lambda i: (i, 0)),
                     pl.BlockSpec((tm, H2), lambda i: (i, 0))]

    flops = 2 * bp * (K_PAD * H1 + H1 * H2 + H2 * OUT_PAD)
    bytes_accessed = (sum(int(a.size) * a.dtype.itemsize for a in in_arrays)
                      + bp * OUT_PAD * 4)

    out = pl.pallas_call(
        functools.partial(_mlp_kernel, dropout=dropout),
        out_shape=jax.ShapeDtypeStruct((bp, OUT_PAD), jnp.float32),
        grid=(n_blocks,),
        in_specs=in_specs,
        out_specs=pl.BlockSpec((tm, OUT_PAD), lambda i: (i, 0)),
        compiler_params=pltpu.CompilerParams(
            dimension_semantics=("parallel",),
            vmem_limit_bytes=32 * 1024 * 1024),
        cost_estimate=pl.CostEstimate(flops=flops, transcendentals=0,
                                      bytes_accessed=bytes_accessed),
    )(*in_arrays)

    return out[:bsz, :OUT_DIM]


# ---- pure-JAX reference (mirrors the kernel's mixed-precision math) ---------
def simple_dnn_ref(x, prepared_params):
    w1, b1, w2, b2, w3, b3 = prepared_params
    bsz = x.shape[0]
    x2 = x.reshape(bsz, IN_DIM).astype(jnp.float32)
    xp = jnp.zeros((bsz, K_PAD), jnp.float32).at[:, :IN_DIM].set(x2)
    xp = xp.astype(jnp.bfloat16)
    h1 = jnp.maximum(jnp.dot(xp, w1, preferred_element_type=jnp.float32) + b1, 0.0)
    h2 = jnp.maximum(jnp.dot(h1.astype(jnp.bfloat16), w2,
                             preferred_element_type=jnp.float32) + b2, 0.0)
    out = jnp.dot(h2.astype(jnp.bfloat16), w3,
                  preferred_element_type=jnp.float32) + b3
    return out[:, :OUT_DIM]


if __name__ == "__main__":
    key = jax.random.PRNGKey(0)
    kx, kp = jax.random.split(key)

    batch = 8
    x = jax.random.normal(kx, (batch, 1, 28, 28), dtype=jnp.float32)
    params = init_params(kp)
    prepared = prepare_params(params)

    # Eval path (dropout=False) — check against pure-JAX reference.
    out_eval = jax.block_until_ready(simple_dnn_forward(x, prepared, dropout=False))
    ref = simple_dnn_ref(x, prepared)
    assert out_eval.shape == (batch, 10)
    assert jnp.allclose(out_eval, ref, atol=2e-3, rtol=2e-3), float(
        jnp.max(jnp.abs(out_eval - ref)))

    # Train path (dropout=True) — run and check shape / finiteness.
    out_train = jax.block_until_ready(
        simple_dnn_forward(x, prepared, dropout=True, seed=123))
    assert out_train.shape == (batch, 10)
    assert bool(jnp.all(jnp.isfinite(out_train)))

    print("KERNEL_OK")
</pallas_src>

<mosaic_0001>
module attributes {stable_mosaic.version = 11 : i64} {
  func.func @_mlp_kernel(%arg0: i32, %arg1: memref<8x896xbf16, #tpu.memory_space<vmem>>, %arg2: memref<896x512xbf16, #tpu.memory_space<vmem>>, %arg3: memref<1x512xf32, #tpu.memory_space<vmem>>, %arg4: memref<512x256xbf16, #tpu.memory_space<vmem>>, %arg5: memref<1x256xf32, #tpu.memory_space<vmem>>, %arg6: memref<256x128xbf16, #tpu.memory_space<vmem>>, %arg7: memref<1x128xf32, #tpu.memory_space<vmem>>, %arg8: memref<8x128xf32, #tpu.memory_space<vmem>>) attributes {dimension_semantics = [#tpu.dimension_semantics<parallel>], iteration_bounds = array<i64: 1>, scalar_prefetch = 0 : i64, scratch_operands = 0 : i64, tpu.core_type = #tpu.core_type<tc>, window_params = [{transform_indices = @transform_0, window_bounds = array<i64: 8, 896>}, {pipeline_mode = #tpu.pipeline_mode<synchronous>, transform_indices = @transform_1, window_bounds = array<i64: 896, 512>}, {pipeline_mode = #tpu.pipeline_mode<synchronous>, transform_indices = @transform_2, window_bounds = array<i64: 1, 512>}, {pipeline_mode = #tpu.pipeline_mode<synchronous>, transform_indices = @transform_3, window_bounds = array<i64: 512, 256>}, {pipeline_mode = #tpu.pipeline_mode<synchronous>, transform_indices = @transform_4, window_bounds = array<i64: 1, 256>}, {pipeline_mode = #tpu.pipeline_mode<synchronous>, transform_indices = @transform_5, window_bounds = array<i64: 256, 128>}, {pipeline_mode = #tpu.pipeline_mode<synchronous>, transform_indices = @transform_6, window_bounds = array<i64: 1, 128>}, {transform_indices = @transform_7, window_bounds = array<i64: 8, 128>}]} {
    %c0 = arith.constant 0 : index
    %c0_0 = arith.constant 0 : index
    %0 = vector.load %arg1[%c0, %c0_0] : memref<8x896xbf16, #tpu.memory_space<vmem>>, vector<8x896xbf16>
    %c0_1 = arith.constant 0 : index
    %c0_2 = arith.constant 0 : index
    %1 = vector.load %arg2[%c0_1, %c0_2] : memref<896x512xbf16, #tpu.memory_space<vmem>>, vector<896x512xbf16>
    %cst = arith.constant dense<0.000000e+00> : vector<8x512xf32>
    %2 = tpu.matmul %0, %1, %cst {dimension_numbers = #tpu.dot_dimension_numbers<[1], [0], [0], [1], [0, 0, 1, 1], [], []>} : vector<8x896xbf16>, vector<896x512xbf16>, vector<8x512xf32> -> vector<8x512xf32>
    %c0_3 = arith.constant 0 : index
    %c0_4 = arith.constant 0 : index
    %3 = vector.load %arg3[%c0_3, %c0_4] : memref<1x512xf32, #tpu.memory_space<vmem>>, vector<1x512xf32>
    %4 = vector.broadcast %3 : vector<1x512xf32> to vector<8x512xf32>
    %5 = arith.addf %2, %4 : vector<8x512xf32>
    %cst_5 = arith.constant 0.000000e+00 : f32
    %6 = vector.broadcast %cst_5 : f32 to vector<8x512xf32>
    %7 = arith.maximumf %5, %6 : vector<8x512xf32>
    %8 = arith.truncf %7 : vector<8x512xf32> to vector<8x512xbf16>
    %c0_6 = arith.constant 0 : index
    %c0_7 = arith.constant 0 : index
    %9 = vector.load %arg4[%c0_6, %c0_7] : memref<512x256xbf16, #tpu.memory_space<vmem>>, vector<512x256xbf16>
    %cst_8 = arith.constant dense<0.000000e+00> : vector<8x256xf32>
    %10 = tpu.matmul %8, %9, %cst_8 {dimension_numbers = #tpu.dot_dimension_numbers<[1], [0], [0], [1], [0, 0, 1, 1], [], []>} : vector<8x512xbf16>, vector<512x256xbf16>, vector<8x256xf32> -> vector<8x256xf32>
    %c0_9 = arith.constant 0 : index
    %c0_10 = arith.constant 0 : index
    %11 = vector.load %arg5[%c0_9, %c0_10] : memref<1x256xf32, #tpu.memory_space<vmem>>, vector<1x256xf32>
    %12 = vector.broadcast %11 : vector<1x256xf32> to vector<8x256xf32>
    %13 = arith.addf %10, %12 : vector<8x256xf32>
    %cst_11 = arith.constant 0.000000e+00 : f32
    %14 = vector.broadcast %cst_11 : f32 to vector<8x256xf32>
    %15 = arith.maximumf %13, %14 : vector<8x256xf32>
    %16 = arith.truncf %15 : vector<8x256xf32> to vector<8x256xbf16>
    %c0_12 = arith.constant 0 : index
    %c0_13 = arith.constant 0 : index
    %17 = vector.load %arg6[%c0_12, %c0_13] : memref<256x128xbf16, #tpu.memory_space<vmem>>, vector<256x128xbf16>
    %cst_14 = arith.constant dense<0.000000e+00> : vector<8x128xf32>
    %18 = tpu.matmul %16, %17, %cst_14 {dimension_numbers = #tpu.dot_dimension_numbers<[1], [0], [0], [1], [0, 0, 1, 1], [], []>} : vector<8x256xbf16>, vector<256x128xbf16>, vector<8x128xf32> -> vector<8x128xf32>
    %c0_15 = arith.constant 0 : index
    %c0_16 = arith.constant 0 : index
    %19 = vector.load %arg7[%c0_15, %c0_16] : memref<1x128xf32, #tpu.memory_space<vmem>>, vector<1x128xf32>
    %20 = vector.broadcast %19 : vector<1x128xf32> to vector<8x128xf32>
    %21 = arith.addf %18, %20 : vector<8x128xf32>
    %c0_17 = arith.constant 0 : index
    %c0_18 = arith.constant 0 : index
    %22 = vector.load %arg8[%c0_17, %c0_18] : memref<8x128xf32, #tpu.memory_space<vmem>>, vector<8x128xf32>
    tpu.vector_store %arg8[%c0_17, %c0_18], %21 {strides = array<i32>} : memref<8x128xf32, #tpu.memory_space<vmem>>, vector<8x128xf32>,
    return
  }
  func.func @transform_0(%arg0: i32) -> (i32, i32) {
    %c0_i32 = arith.constant 0 : i32
    %c0_i32_0 = arith.constant 0 : i32
    return %arg0, %c0_i32 : i32, i32
  }
  func.func @transform_1(%arg0: i32) -> (i32, i32) {
    %c0_i32 = arith.constant 0 : i32
    %c0_i32_0 = arith.constant 0 : i32
    %c0_i32_1 = arith.constant 0 : i32
    return %c0_i32, %c0_i32_0 : i32, i32
  }
  func.func @transform_2(%arg0: i32) -> (i32, i32) {
    %c0_i32 = arith.constant 0 : i32
    %c0_i32_0 = arith.constant 0 : i32
    %c0_i32_1 = arith.constant 0 : i32
    return %c0_i32, %c0_i32_0 : i32, i32
  }
  func.func @transform_3(%arg0: i32) -> (i32, i32) {
    %c0_i32 = arith.constant 0 : i32
    %c0_i32_0 = arith.constant 0 : i32
    %c0_i32_1 = arith.constant 0 : i32
    return %c0_i32, %c0_i32_0 : i32, i32
  }
  func.func @transform_4(%arg0: i32) -> (i32, i32) {
    %c0_i32 = arith.constant 0 : i32
    %c0_i32_0 = arith.constant 0 : i32
    %c0_i32_1 = arith.constant 0 : i32
    return %c0_i32, %c0_i32_0 : i32, i32
  }
  func.func @transform_5(%arg0: i32) -> (i32, i32) {
    %c0_i32 = arith.constant 0 : i32
    %c0_i32_0 = arith.constant 0 : i32
    %c0_i32_1 = arith.constant 0 : i32
    return %c0_i32, %c0_i32_0 : i32, i32
  }
  func.func @transform_6(%arg0: i32) -> (i32, i32) {
    %c0_i32 = arith.constant 0 : i32
    %c0_i32_0 = arith.constant 0 : i32
    %c0_i32_1 = arith.constant 0 : i32
    return %c0_i32, %c0_i32_0 : i32, i32
  }
  func.func @transform_7(%arg0: i32) -> (i32, i32) {
    %c0_i32 = arith.constant 0 : i32
    %c0_i32_0 = arith.constant 0 : i32
    return %arg0, %c0_i32 : i32, i32
  }
}

</mosaic_0001>

<bundles_post_ra>
// kernel: tpu_custom_call.1
= control target key start
LH: loop header
LB: loop body
LE: loop exit
PB: predicated region body
PF: predicated region fallthrough
CT: control target
= control target key end

     0   :  { %12 = vsyncpa [#allocation3], 0  ;;  %s3615_s0 = inlined_call_operand.hbm [shape: bf16[8,896], index: 0, kind: input, shape index: {}]   ;;  %s3616_s1 = inlined_call_operand.hbm [shape: bf16[896,512], index: 1, kind: input, shape index: {}]   ;;  %s3617_s2 = inlined_call_operand.vmem [shape: f32[1,512], index: 2, kind: input, shape index: {}]   ;;  %s3618_s3 = inlined_call_operand.hbm [shape: bf16[512,256], index: 3, kind: input, shape index: {}]   ;;  %s3619_s4 = inlined_call_operand.vmem [shape: f32[1,256], index: 4, kind: input, shape index: {}]   ;;  %s3620_s5 = inlined_call_operand.hbm [shape: bf16[256,128], index: 5, kind: input, shape index: {}]   ;;  %s3621_s6 = inlined_call_operand.vmem [shape: f32[1,128], index: 6, kind: input, shape index: {}]   ;;  %s3622_s7 = inlined_call_operand.hbm [shape: f32[8,128], index: 7, kind: output, shape index: {}]  }
   0x1   :  { %13 = vsyncpa [#allocation6], 0 }
   0x2   :  { %14 = vsyncpa [#allocation9], 0 }
   0x3   :  { %15 = vsyncpa [#allocation4], 0  ;;  %s3438_s24 = smov [#allocation5]   ;;  %s3320_s28 = scalar_lea.hbm %s3616_s1, 28672 }
   0x4   :  { %s31_s25 = sshll.u32 %s3438_s24, 4  ;;  %p3321_p0 = scmp.ne.s32.totalorder %s3616_s1, %s3320_s28  ;;  %s32_s25 = int_to_ptr.vmem [resolvable:$true] %s31_s25 }
   0x5   :  { %p3324_p1 = scmp.lt.u32.totalorder %s3320_s28, %s3616_s1 }
   0x7   :  { %p3326_p2 = pnand %p3324_p1, %p3321_p0 }
   0x9   :  { %3329 = shalt.err (!%p3326_p2)
}
   0xa   :  { %s3330_s10 = scalar_lea.vmem %s32_s25, 28672  ;;  %p3335_p4 = scmp.lt.s32.totalorder %s32_s25, %s32_s25 }
   0xb   :  { %p3331_p3 = scmp.ne.s32.totalorder %s32_s25, %s3330_s10  ;;  %p3336_p5 = scmp.lt.s32.totalorder %s3330_s10, %s3330_s10 }
   0xd   :  { %p3337_p6 = por %p3336_p5, %p3335_p4 }
   0xf   :  { %p3338_p7 = pnand %p3337_p6, %p3331_p3 }
  0x11   :  { %3341 = shalt.err (!%p3338_p7)
}
  0x12   :  { %s3439_s11 = smov 256   ;;  %s3440_s12 = smov 16  }
  0x13   :  { %37 = dma.hbm_to_vmem [thread:$0]  %s3616_s1, 28672, %s32_s25, [#allocation6], %s3439_s11, %s3439_s11, %s3440_s12  }
  0x14   :  { %s3441_s15 = smov [#allocation2]   ;;  %s3442_s17 = smov [#allocation7]  }
  0x15   :  { %s22_s16 = sshll.u32 %s3441_s15, 4  ;;  %s45_s18 = sshll.u32 %s3442_s17, 4  ;;  %s23_s16 = int_to_ptr.vmem [resolvable:$true] %s22_s16  ;;  %s46_s18 = int_to_ptr.vmem [resolvable:$true] %s45_s18 }
  0x16   :  { %s3342_s21 = scalar_lea.hbm %s3615_s0, 448 }
  0x17   :  { %p3343_p8 = scmp.ne.s32.totalorder %s3615_s0, %s3342_s21  ;;  %p3346_p9 = scmp.lt.u32.totalorder %s3342_s21, %s3615_s0 }
  0x19   :  { %p3348_p10 = pnand %p3346_p9, %p3343_p8 }
  0x1b   :  { %3351 = shalt.err (!%p3348_p10)
}
  0x1c   :  { %s3352_s1 = scalar_lea.vmem %s23_s16, 448  ;;  %p3357_p12 = scmp.lt.s32.totalorder %s23_s16, %s23_s16 }
  0x1d   :  { %p3353_p11 = scmp.ne.s32.totalorder %s23_s16, %s3352_s1  ;;  %p3358_p13 = scmp.lt.s32.totalorder %s3352_s1, %s3352_s1 }
  0x1f   :  { %p3359_p0 = por %p3358_p13, %p3357_p12 }
  0x21   :  { %p3360_p1 = pnand %p3359_p0, %p3353_p11 }
  0x23   :  { %3363 = shalt.err (!%p3360_p1)
}
  0x24   :  { %25 = dma.hbm_to_vmem [thread:$0]  %s3615_s0, 448, %s23_s16, [#allocation3]  }
  0x25   :  { %s3364_s30 = scalar_lea.hbm %s3618_s3, 8192 }
  0x26   :  { %p3365_p2 = scmp.ne.s32.totalorder %s3618_s3, %s3364_s30  ;;  %p3368_p3 = scmp.lt.u32.totalorder %s3364_s30, %s3618_s3 }
  0x28   :  { %p3370_p4 = pnand %p3368_p3, %p3365_p2 }
  0x2a   :  { %3373 = shalt.err (!%p3370_p4)
}
  0x2b   :  { %s3374_s12 = scalar_lea.vmem %s46_s18, 8192  ;;  %p3379_p6 = scmp.lt.s32.totalorder %s46_s18, %s46_s18 }
  0x2c   :  { %p3375_p5 = scmp.ne.s32.totalorder %s46_s18, %s3374_s12  ;;  %p3380_p7 = scmp.lt.s32.totalorder %s3374_s12, %s3374_s12 }
  0x2e   :  { %p3381_p8 = por %p3380_p7, %p3379_p6 }
  0x30   :  { %p3382_p9 = pnand %p3381_p8, %p3375_p5 }
  0x32   :  { %3385 = shalt.err (!%p3382_p9)
}
  0x33   :  { %s3443_s0 = smov 128   ;;  %s3444_s13 = smov 8  }
  0x34   :  { %51 = dma.hbm_to_vmem [thread:$0]  %s3618_s3, 8192, %s46_s18, [#allocation6], %s3443_s0, %s3443_s0, %s3444_s13  }
  0x35   :  { %s3445_s16 = smov [#allocation8]   ;;  %s3386_s21 = scalar_lea.hbm %s3620_s5, 2048 }
  0x36   :  { %s59_s17 = sshll.u32 %s3445_s16, 4  ;;  %p3387_p10 = scmp.ne.s32.totalorder %s3620_s5, %s3386_s21  ;;  %s60_s17 = int_to_ptr.vmem [resolvable:$true] %s59_s17 }
  0x37   :  { %p3390_p11 = scmp.lt.u32.totalorder %s3386_s21, %s3620_s5 }
  0x39   :  { %p3392_p12 = pnand %p3390_p11, %p3387_p10 }
  0x3b   :  { %3395 = shalt.err (!%p3392_p12)
}
  0x3c   :  { %s3396_s1 = scalar_lea.vmem %s60_s17, 2048  ;;  %p3401_p0 = scmp.lt.s32.totalorder %s60_s17, %s60_s17 }
  0x3d   :  { %p3397_p13 = scmp.ne.s32.totalorder %s60_s17, %s3396_s1  ;;  %p3402_p1 = scmp.lt.s32.totalorder %s3396_s1, %s3396_s1 }
  0x3f   :  { %p3403_p2 = por %p3402_p1, %p3401_p0 }
  0x41   :  { %p3404_p3 = pnand %p3403_p2, %p3397_p13 }
  0x43   :  { %3407 = shalt.err (!%p3404_p3)
}
  0x44   :  { %s3446_s3 = smov 64   ;;  %s3447_s18 = smov 4  }
  0x45   :  { %65 = dma.hbm_to_vmem [thread:$0]  %s3620_s5, 2048, %s60_s17, [#allocation9], %s3446_s3, %s3446_s3, %s3447_s18  }
  0x46   :  { %3430 = dma.done.wait [#allocation3], 448  }
  0x47   :  { %3431 = vsyncadd [#allocation3], 4294966848 }
  0x48   :  { %3432 = dma.done.wait [#allocation6], 36864  }
  0x49   :  { %3433 = vsyncadd [#allocation6], 4294930432 }
  0x4a   :  { %3434 = dma.done.wait [#allocation9], 2048  }
  0x4b   :  { %3435 = vsyncadd [#allocation9], 4294965248  ;;  %v2865_v0 = vld [vmem:[#allocation5 + $0x4] ss:$16 sps:$4 sm:$0xff]   ;;  %v2869_v2 = vld [vmem:[#allocation5] ss:$16 sps:$4 sm:$0xff]  }
  0x4c   :  { %v2867_v1 = vld [vmem:[#allocation5 + $0x204] ss:$16 sps:$4 sm:$0xff]   ;;  %1476 = vmatprep.subr.bf16.mxu1 %v2865_v0  ;;  %v2870_v3 = vld [vmem:[#allocation5 + $0x200] ss:$16 sps:$4 sm:$0xff]   ;;  %s3449_s8 = smov [#allocation10]  }
  0x4d   :  { %1517 = vmatprep.subr.bf16.mxu0 %v2867_v1  ;;  %v2871_v4 = vld [vmem:[#allocation5 + $0x24] ss:$16 sps:$4 sm:$0xff]   ;;  %1477 = vmatpush1.bf16.msra.mxu1 %v2869_v2  ;;  %v2875_v6 = vld [vmem:[#allocation5 + $0x20] ss:$16 sps:$4 sm:$0xff]   ;;  %s2476_s9 = sshll.u32 %s3449_s8, 4  ;;  %s2477_s9 = int_to_ptr.vmem [resolvable:$true] %s2476_s9 }
  0x4e   :  { %1518 = vmatpush1.bf16.msra.mxu0 %v2870_v3  ;;  %v2873_v5 = vld [vmem:[#allocation5 + $0x224] ss:$16 sps:$4 sm:$0xff]   ;;  %1478 = vmatprep.subr.bf16.mxu1 %v2871_v4  ;;  %v2876_v7 = vld [vmem:[#allocation5 + $0x220] ss:$16 sps:$4 sm:$0xff]   ;;  %s3408_s10 = scalar_lea.vmem %s2477_s9, 128  ;;  %p3413_p5 = scmp.lt.s32.totalorder %s2477_s9, %s2477_s9 }
  0x4f   :  { %1519 = vmatprep.subr.bf16.mxu0 %v2873_v5  ;;  %v2877_v8 = vld [vmem:[#allocation5 + $0x44] ss:$16 sps:$4 sm:$0xff]   ;;  %v2881_v10 = vld [vmem:[#allocation5 + $0x40] ss:$16 sps:$4 sm:$0xff]   ;;  %v2970_v5 = vld [vmem:[#allocation5 + $0xc] ss:$16 sps:$4 sm:$0xff]   ;;  %p3409_p4 = scmp.ne.s32.totalorder %s2477_s9, %s3408_s10  ;;  %p3414_p6 = scmp.lt.s32.totalorder %s3408_s10, %s3408_s10 }
  0x50   :  { %v2879_v9 = vld [vmem:[#allocation5 + $0x244] ss:$16 sps:$4 sm:$0xff]   ;;  %v2882_v11 = vld [vmem:[#allocation5 + $0x240] ss:$16 sps:$4 sm:$0xff]  }
  0x51   :  { %1479 = vmatpush1.bf16.msra.mxu1 %v2875_v6  ;;  %v2883_v12 = vld [vmem:[#allocation5 + $0x64] ss:$16 sps:$4 sm:$0xff]   ;;  %v2887_v14 = vld [vmem:[#allocation5 + $0x60] ss:$16 sps:$4 sm:$0xff]   ;;  %p3415_p7 = por %p3414_p6, %p3413_p5 }
  0x52   :  { %1520 = vmatpush1.bf16.msra.mxu0 %v2876_v7  ;;  %1480 = vmatprep.subr.bf16.mxu1 %v2877_v8  ;;  %v2885_v13 = vld [vmem:[#allocation5 + $0x264] ss:$16 sps:$4 sm:$0xff]   ;;  %v2888_v15 = vld [vmem:[#allocation5 + $0x260] ss:$16 sps:$4 sm:$0xff]  }
  0x53   :  { %1521 = vmatprep.subr.bf16.mxu0 %v2879_v9  ;;  %v2889_v16 = vld [vmem:[#allocation5 + $0x84] ss:$16 sps:$4 sm:$0xff]   ;;  %v2893_v18 = vld [vmem:[#allocation5 + $0x80] ss:$16 sps:$4 sm:$0xff]   ;;  %v2968_v9 = vld [vmem:[#allocation5 + $0x8] ss:$16 sps:$4 sm:$0xff]   ;;  %p3416_p8 = pnand %p3415_p7, %p3409_p4 }
  0x54   :  { %v2891_v17 = vld [vmem:[#allocation5 + $0x284] ss:$16 sps:$4 sm:$0xff]   ;;  %v2894_v19 = vld [vmem:[#allocation5 + $0x280] ss:$16 sps:$4 sm:$0xff]  }
  0x55   :  { %1481 = vmatpush1.bf16.msra.mxu1 %v2881_v10  ;;  %v2895_v20 = vld [vmem:[#allocation5 + $0xa4] ss:$16 sps:$4 sm:$0xff]   ;;  %v2899_v22 = vld [vmem:[#allocation5 + $0xa0] ss:$16 sps:$4 sm:$0xff]  }
  0x56   :  { %1522 = vmatpush1.bf16.msra.mxu0 %v2882_v11  ;;  %1482 = vmatprep.subr.bf16.mxu1 %v2883_v12  ;;  %v2897_v21 = vld [vmem:[#allocation5 + $0x2a4] ss:$16 sps:$4 sm:$0xff]   ;;  %v2900_v23 = vld [vmem:[#allocation5 + $0x2a0] ss:$16 sps:$4 sm:$0xff]   ;;  %v2976_v11 = vld [vmem:[#allocation5 + $0x2c] ss:$16 sps:$4 sm:$0xff]  }
  0x57   :  { %1523 = vmatprep.subr.bf16.mxu0 %v2885_v13  ;;  %v2901_v24 = vld [vmem:[#allocation5 + $0xc4] ss:$16 sps:$4 sm:$0xff]   ;;  %v2905_v26 = vld [vmem:[#allocation5 + $0xc0] ss:$16 sps:$4 sm:$0xff]   ;;  %v2974_v13 = vld [vmem:[#allocation5 + $0x28] ss:$16 sps:$4 sm:$0xff]  }
  0x58   :  { %v2903_v25 = vld [vmem:[#allocation5 + $0x2c4] ss:$16 sps:$4 sm:$0xff]   ;;  %v2906_v27 = vld [vmem:[#allocation5 + $0x2c0] ss:$16 sps:$4 sm:$0xff]  }
  0x59   :  { %1483 = vmatpush1.bf16.msra.mxu1 %v2887_v14  ;;  %v2907_v28 = vld [vmem:[#allocation5 + $0xe4] ss:$16 sps:$4 sm:$0xff]   ;;  %v2911_v30 = vld [vmem:[#allocation5 + $0xe0] ss:$16 sps:$4 sm:$0xff]  }
  0x5a   :  { %1524 = vmatpush1.bf16.msra.mxu0 %v2888_v15  ;;  %1484 = vmatprep.subr.bf16.mxu1 %v2889_v16  ;;  %v2909_v29 = vld [vmem:[#allocation5 + $0x2e4] ss:$16 sps:$4 sm:$0xff]   ;;  %v2912_v31 = vld [vmem:[#allocation5 + $0x2e0] ss:$16 sps:$4 sm:$0xff]   ;;  %v2982_v15 = vld [vmem:[#allocation5 + $0x4c] ss:$16 sps:$4 sm:$0xff]  }
  0x5b   :  { %1525 = vmatprep.subr.bf16.mxu0 %v2891_v17  ;;  %v2913_v32 = vld [vmem:[#allocation5 + $0x104] ss:$16 sps:$4 sm:$0xff]   ;;  %v2917_v34 = vld [vmem:[#allocation5 + $0x100] ss:$16 sps:$4 sm:$0xff]   ;;  %v2980_v17 = vld [vmem:[#allocation5 + $0x48] ss:$16 sps:$4 sm:$0xff]  }
  0x5c   :  { %v2915_v33 = vld [vmem:[#allocation5 + $0x304] ss:$16 sps:$4 sm:$0xff]   ;;  %v2918_v35 = vld [vmem:[#allocation5 + $0x300] ss:$16 sps:$4 sm:$0xff]  }
  0x5d   :  { %1485 = vmatpush1.bf16.msra.mxu1 %v2893_v18  ;;  %v2919_v36 = vld [vmem:[#allocation5 + $0x124] ss:$16 sps:$4 sm:$0xff]   ;;  %v2923_v38 = vld [vmem:[#allocation5 + $0x120] ss:$16 sps:$4 sm:$0xff]  }
  0x5e   :  { %1526 = vmatpush1.bf16.msra.mxu0 %v2894_v19  ;;  %1486 = vmatprep.subr.bf16.mxu1 %v2895_v20  ;;  %v2921_v37 = vld [vmem:[#allocation5 + $0x324] ss:$16 sps:$4 sm:$0xff]   ;;  %v2924_v39 = vld [vmem:[#allocation5 + $0x320] ss:$16 sps:$4 sm:$0xff]   ;;  %v2988_v19 = vld [vmem:[#allocation5 + $0x6c] ss:$16 sps:$4 sm:$0xff]  }
  0x5f   :  { %1527 = vmatprep.subr.bf16.mxu0 %v2897_v21  ;;  %v2925_v40 = vld [vmem:[#allocation5 + $0x144] ss:$16 sps:$4 sm:$0xff]   ;;  %v2929_v42 = vld [vmem:[#allocation5 + $0x140] ss:$16 sps:$4 sm:$0xff]   ;;  %v2986_v21 = vld [vmem:[#allocation5 + $0x68] ss:$16 sps:$4 sm:$0xff]  }
  0x60   :  { %v2927_v41 = vld [vmem:[#allocation5 + $0x344] ss:$16 sps:$4 sm:$0xff]   ;;  %v2930_v43 = vld [vmem:[#allocation5 + $0x340] ss:$16 sps:$4 sm:$0xff]  }
  0x61   :  { %1487 = vmatpush1.bf16.msra.mxu1 %v2899_v22  ;;  %v2931_v44 = vld [vmem:[#allocation5 + $0x164] ss:$16 sps:$4 sm:$0xff]   ;;  %v82_v48 = vld [vmem:[#allocation2 + $0x8] sm:$0xff] }
  0x62   :  { %1528 = vmatpush1.bf16.msra.mxu0 %v2900_v23  ;;  %1488 = vmatprep.subr.bf16.mxu1 %v2901_v24  ;;  %v2933_v45 = vld [vmem:[#allocation5 + $0x364] ss:$16 sps:$4 sm:$0xff]   ;;  %v2935_v49 = vld [vmem:[#allocation5 + $0x160] ss:$16 sps:$4 sm:$0xff]   ;;  %v3540_v51 = vcombine.high %v82_v48, %v82_v48  ;;  %v3546_v7 = vcombine.low %v82_v48, %v82_v48  ;;  %v2994_v23 = vld [vmem:[#allocation5 + $0x8c] ss:$16 sps:$4 sm:$0xff]  }
  0x63   :  { %1529 = vmatprep.subr.bf16.mxu0 %v2903_v25  ;;  %v81_v46 = vld [vmem:[#allocation2] sm:$0xff]  ;;  %v2936_v50 = vld [vmem:[#allocation5 + $0x360] ss:$16 sps:$4 sm:$0xff]  }
  0x64   :  { %v3538_v47 = vcombine.high %v81_v46, %v81_v46  ;;  %v2937_v52 = vld [vmem:[#allocation5 + $0x184] ss:$16 sps:$4 sm:$0xff]   ;;  %1549 = vmatprep.mubr.bf16.mxu0 %v3540_v51  ;;  %v2941_v54 = vld [vmem:[#allocation5 + $0x180] ss:$16 sps:$4 sm:$0xff]   ;;  %v3544_v6 = vcombine.low %v81_v46, %v81_v46  ;;  %v2992_v25 = vld [vmem:[#allocation5 + $0x88] ss:$16 sps:$4 sm:$0xff]  }
  0x65   :  { %1489 = vmatpush1.bf16.msra.mxu1 %v2905_v26  ;;  %v2939_v53 = vld [vmem:[#allocation5 + $0x384] ss:$16 sps:$4 sm:$0xff]   ;;  %v2942_v55 = vld [vmem:[#allocation5 + $0x380] ss:$16 sps:$4 sm:$0xff]  }
  0x66   :  { %1530 = vmatpush1.bf16.msra.mxu0 %v2906_v27  ;;  %1490 = vmatprep.subr.bf16.mxu1 %v2907_v28  ;;  %v2943_v56 = vld [vmem:[#allocation5 + $0x1a4] ss:$16 sps:$4 sm:$0xff]   ;;  %v2947_v58 = vld [vmem:[#allocation5 + $0x1a0] ss:$16 sps:$4 sm:$0xff]   ;;  %v3000_v27 = vld [vmem:[#allocation5 + $0xac] ss:$16 sps:$4 sm:$0xff]  }
  0x67   :  { %1531 = vmatprep.subr.bf16.mxu0 %v2909_v29  ;;  %1508 = vmatprep.mubr.bf16.mxu1 %v3538_v47  ;;  %v2945_v57 = vld [vmem:[#allocation5 + $0x3a4] ss:$16 sps:$4 sm:$0xff]   ;;  %v2948_v59 = vld [vmem:[#allocation5 + $0x3a0] ss:$16 sps:$4 sm:$0xff]   ;;  %v2998_v29 = vld [vmem:[#allocation5 + $0xa8] ss:$16 sps:$4 sm:$0xff]  }
  0x68   :  { %v2949_v60 = vld [vmem:[#allocation5 + $0x1c4] ss:$16 sps:$4 sm:$0xff]   ;;  %v2953_v62 = vld [vmem:[#allocation5 + $0x1c0] ss:$16 sps:$4 sm:$0xff]  }
  0x69   :  { %1491 = vmatpush1.bf16.msra.mxu1 %v2911_v30  ;;  %v2951_v61 = vld [vmem:[#allocation5 + $0x3c4] ss:$16 sps:$4 sm:$0xff]   ;;  %v2954_v63 = vld [vmem:[#allocation5 + $0x3c0] ss:$16 sps:$4 sm:$0xff]  }
  0x6a   :  { %1532 = vmatpush1.bf16.msra.mxu0 %v2912_v31  ;;  %1492 = vmatprep.subr.bf16.mxu1 %v2913_v32  ;;  %v2955_v0 = vld [vmem:[#allocation5 + $0x1e4] ss:$16 sps:$4 sm:$0xff]   ;;  %v2959_v2 = vld [vmem:[#allocation5 + $0x1e0] ss:$16 sps:$4 sm:$0xff]   ;;  %v3006_v31 = vld [vmem:[#allocation5 + $0xcc] ss:$16 sps:$4 sm:$0xff]  }
  0x6b   :  { %1533 = vmatprep.subr.bf16.mxu0 %v2915_v33  ;;  %v2957_v1 = vld [vmem:[#allocation5 + $0x3e4] ss:$16 sps:$4 sm:$0xff]   ;;  %v2960_v3 = vld [vmem:[#allocation5 + $0x3e0] ss:$16 sps:$4 sm:$0xff]  }
  0x6c   :  { %v2967_v4 = vld [vmem:[#allocation5 + $0x404] ss:$16 sps:$4 sm:$0xff]   ;;  %v2965_v8 = vld [vmem:[#allocation5 + $0x400] ss:$16 sps:$4 sm:$0xff]  }
  0x6d   :  { %1493 = vmatpush1.bf16.msra.mxu1 %v2917_v34  ;;  %v2973_v10 = vld [vmem:[#allocation5 + $0x424] ss:$16 sps:$4 sm:$0xff]   ;;  %v2971_v12 = vld [vmem:[#allocation5 + $0x420] ss:$16 sps:$4 sm:$0xff]  }
  0x6e   :  { %1534 = vmatpush1.bf16.msra.mxu0 %v2918_v35  ;;  %1494 = vmatprep.subr.bf16.mxu1 %v2919_v36  ;;  %v2979_v14 = vld [vmem:[#allocation5 + $0x444] ss:$16 sps:$4 sm:$0xff]   ;;  %v2977_v16 = vld [vmem:[#allocation5 + $0x440] ss:$16 sps:$4 sm:$0xff]   ;;  %v3004_v35 = vld [vmem:[#allocation5 + $0xc8] ss:$16 sps:$4 sm:$0xff]  }
  0x6f   :  { %1535 = vmatprep.subr.bf16.mxu0 %v2921_v37  ;;  %v2985_v18 = vld [vmem:[#allocation5 + $0x464] ss:$16 sps:$4 sm:$0xff]   ;;  %v2983_v20 = vld [vmem:[#allocation5 + $0x460] ss:$16 sps:$4 sm:$0xff]   ;;  %v3012_v37 = vld [vmem:[#allocation5 + $0xec] ss:$16 sps:$4 sm:$0xff]  }
  0x70   :  { %v2991_v22 = vld [vmem:[#allocation5 + $0x484] ss:$16 sps:$4 sm:$0xff]   ;;  %v2989_v24 = vld [vmem:[#allocation5 + $0x480] ss:$16 sps:$4 sm:$0xff]  }
  0x71   :  { %1495 = vmatpush1.bf16.msra.mxu1 %v2923_v38  ;;  %v2997_v26 = vld [vmem:[#allocation5 + $0x4a4] ss:$16 sps:$4 sm:$0xff]   ;;  %v2995_v28 = vld [vmem:[#allocation5 + $0x4a0] ss:$16 sps:$4 sm:$0xff]  }
  0x72   :  { %1536 = vmatpush1.bf16.msra.mxu0 %v2924_v39  ;;  %1496 = vmatprep.subr.bf16.mxu1 %v2925_v40  ;;  %v3003_v30 = vld [vmem:[#allocation5 + $0x4c4] ss:$16 sps:$4 sm:$0xff]   ;;  %v3001_v33 = vld [vmem:[#allocation5 + $0x4c0] ss:$16 sps:$4 sm:$0xff]   ;;  %v3010_v39 = vld [vmem:[#allocation5 + $0xe8] ss:$16 sps:$4 sm:$0xff]  }
  0x73   :  { %1537 = vmatprep.subr.bf16.mxu0 %v2927_v41  ;;  %v3551_v32 = vld [vmem:[#allocation2 + $0x10] sm:$0xff]  ;;  %v3007_v38 = vld [vmem:[#allocation5 + $0x4e0] ss:$16 sps:$4 sm:$0xff]   ;;  %v3018_v41 = vld [vmem:[#allocation5 + $0x10c] ss:$16 sps:$4 sm:$0xff]  }
  0x74   :  { %v3555_v34 = vcombine.high %v3551_v32, %v3551_v32  ;;  %v3009_v36 = vld [vmem:[#allocation5 + $0x4e4] ss:$16 sps:$4 sm:$0xff]   ;;  %v3019_v46 = vld [vmem:[#allocation5 + $0x520] ss:$16 sps:$4 sm:$0xff]  }
  0x75   :  { %1497 = vmatpush1.bf16.msra.mxu1 %v2929_v42  ;;  %v3015_v40 = vld [vmem:[#allocation5 + $0x504] ss:$16 sps:$4 sm:$0xff]   ;;  %v3013_v42 = vld [vmem:[#allocation5 + $0x500] ss:$16 sps:$4 sm:$0xff]  }
  0x76   :  { %1538 = vmatpush1.bf16.msra.mxu0 %v2930_v43  ;;  %1498 = vmatprep.subr.bf16.mxu1 %v2931_v44  ;;  %v3016_v43 = vld [vmem:[#allocation5 + $0x108] ss:$16 sps:$4 sm:$0xff]   ;;  %v3021_v44 = vld [vmem:[#allocation5 + $0x524] ss:$16 sps:$4 sm:$0xff]  }
  0x77   :  { %1539 = vmatprep.subr.bf16.mxu0 %v2933_v45  ;;  %v3024_v45 = vld [vmem:[#allocation5 + $0x12c] ss:$16 sps:$4 sm:$0xff]   ;;  %v3027_v48 = vld [vmem:[#allocation5 + $0x544] ss:$16 sps:$4 sm:$0xff]  }
  0x79   :  { %1499 = vmatpush1.bf16.msra.mxu1 %v2935_v49  ;;  %v3030_v49 = vld [vmem:[#allocation5 + $0x14c] ss:$16 sps:$4 sm:$0xff]  }
  0x7a   :  { %1540 = vmatpush1.bf16.msra.mxu0 %v2936_v50  ;;  %1500 = vmatprep.subr.bf16.mxu1 %v2937_v52  ;;  %v3025_v50 = vld [vmem:[#allocation5 + $0x540] ss:$16 sps:$4 sm:$0xff]   ;;  %v3028_v52 = vld [vmem:[#allocation5 + $0x148] ss:$16 sps:$4 sm:$0xff]  }
  0x7b   :  { %1541 = vmatprep.subr.bf16.mxu0 %v2939_v53  ;;  %v3033_v53 = vld [vmem:[#allocation5 + $0x564] ss:$16 sps:$4 sm:$0xff]  }
  0x7d   :  { %1501 = vmatpush1.bf16.msra.mxu1 %v2941_v54  ;;  %v3036_v54 = vld [vmem:[#allocation5 + $0x16c] ss:$16 sps:$4 sm:$0xff]  }
  0x7e   :  { %1542 = vmatpush1.bf16.msra.mxu0 %v2942_v55  ;;  %1502 = vmatprep.subr.bf16.mxu1 %v2943_v56  ;;  %v3031_v55 = vld [vmem:[#allocation5 + $0x560] ss:$16 sps:$4 sm:$0xff]   ;;  %v3034_v56 = vld [vmem:[#allocation5 + $0x168] ss:$16 sps:$4 sm:$0xff]  }
  0x7f   :  { %1543 = vmatprep.subr.bf16.mxu0 %v2945_v57  ;;  %v3039_v57 = vld [vmem:[#allocation5 + $0x584] ss:$16 sps:$4 sm:$0xff]  }
  0x81   :  { %1503 = vmatpush1.bf16.msra.mxu1 %v2947_v58  ;;  %v3042_v58 = vld [vmem:[#allocation5 + $0x18c] ss:$16 sps:$4 sm:$0xff]  }
  0x82   :  { %1544 = vmatpush1.bf16.msra.mxu0 %v2948_v59  ;;  %1504 = vmatprep.subr.bf16.mxu1 %v2949_v60  ;;  %v3037_v59 = vld [vmem:[#allocation5 + $0x580] ss:$16 sps:$4 sm:$0xff]   ;;  %v3040_v60 = vld [vmem:[#allocation5 + $0x188] ss:$16 sps:$4 sm:$0xff]  }
  0x83   :  { %1545 = vmatprep.subr.bf16.mxu0 %v2951_v61  ;;  %v3045_v61 = vld [vmem:[#allocation5 + $0x5a4] ss:$16 sps:$4 sm:$0xff]  }
  0x85   :  { %1505 = vmatpush1.bf16.msra.mxu1 %v2953_v62  ;;  %v3048_v62 = vld [vmem:[#allocation5 + $0x1ac] ss:$16 sps:$4 sm:$0xff]  }
  0x86   :  { %1546 = vmatpush1.bf16.msra.mxu0 %v2954_v63  ;;  %1506 = vmatprep.subr.bf16.mxu1 %v2955_v0  ;;  %v3043_v63 = vld [vmem:[#allocation5 + $0x5a0] ss:$16 sps:$4 sm:$0xff]   ;;  %v3046_v0 = vld [vmem:[#allocation5 + $0x1a8] ss:$16 sps:$4 sm:$0xff]  }
  0x87   :  { %1547 = vmatprep.subr.bf16.mxu0 %v2957_v1  ;;  %v3051_v1 = vld [vmem:[#allocation5 + $0x5c4] ss:$16 sps:$4 sm:$0xff]  }
  0x89   :  { %1507 = vmatpush1.bf16.msra.mxu1 %v2959_v2  ;;  %v3054_v2 = vld [vmem:[#allocation5 + $0x1cc] ss:$16 sps:$4 sm:$0xff]  }
  0x8a   :  { %1548 = vmatpush1.bf16.msra.mxu0 %v2960_v3  ;;  %1640 = vmatprep.subr.bf16.mxu1 %v2970_v5  ;;  %v3049_v3 = vld [vmem:[#allocation5 + $0x5c0] ss:$16 sps:$4 sm:$0xff]   ;;  %v3057_v5 = vld [vmem:[#allocation5 + $0x5e4] ss:$16 sps:$4 sm:$0xff]  }
  0x8b   :  { %1558 = vmatprep.subr.bf16.mxu0 %v2967_v4  ;;  %v3052_v4 = vld [vmem:[#allocation5 + $0x1c8] ss:$16 sps:$4 sm:$0xff]  }
  0x8c   :  { %1509 = vmatmul.mubr.bf16.vlgmr.msra.gmra.mrb[0].mxu1 %v3544_v6 }
  0x8d   :  { %1550 = vmatmul.mubr.bf16.vlgmr.msra.gmra.mrb[0].mxu0 %v3546_v7  ;;  %1641 = vmatpush1.bf16.msra.mxu1 %v2968_v9  ;;  %v3055_v9 = vld [vmem:[#allocation5 + $0x5e0] ss:$16 sps:$4 sm:$0xff]  }
  0x8e   :  { %1559 = vmatpush1.bf16.msra.mxu0 %v2965_v8  ;;  %1642 = vmatprep.subr.bf16.mxu1 %v2976_v11  ;;  %v3060_v8 = vld [vmem:[#allocation5 + $0x1ec] ss:$16 sps:$4 sm:$0xff]   ;;  %v3065_v11 = vld [vmem:[#allocation5 + $0x604] ss:$16 sps:$4 sm:$0xff]  }
  0x8f   :  { %1560 = vmatprep.subr.bf16.mxu0 %v2973_v10  ;;  %1672 = vmatprep.mubr.bf16.mxu1 %v3538_v47  ;;  %v3022_v47 = vld [vmem:[#allocation5 + $0x128] ss:$16 sps:$4 sm:$0xff]  }
  0x90   :  { %1590 = vmatprep.mubr.bf16.mxu0 %v3555_v34  ;;  %v3058_v10 = vld [vmem:[#allocation5 + $0x1e8] ss:$16 sps:$4 sm:$0xff]  }
  0x91   :  { %1643 = vmatpush1.bf16.msra.mxu1 %v2974_v13  ;;  %v3560_v13 = vcombine.low %v3551_v32, %v3551_v32  ;;  %v3098_v32 = vld [vmem:[#allocation5 + $0x2ac] ss:$16 sps:$4 sm:$0xff]  }
  0x92   :  { %1561 = vmatpush1.bf16.msra.mxu0 %v2971_v12  ;;  %1644 = vmatprep.subr.bf16.mxu1 %v2982_v15  ;;  %v3068_v12 = vld [vmem:[#allocation5 + $0x20c] ss:$16 sps:$4 sm:$0xff]   ;;  %v3066_v15 = vld [vmem:[#allocation5 + $0x208] ss:$16 sps:$4 sm:$0xff]  }
  0x93   :  { %1562 = vmatprep.subr.bf16.mxu0 %v2979_v14  ;;  %v3063_v14 = vld [vmem:[#allocation5 + $0x600] ss:$16 sps:$4 sm:$0xff]  }
  0x95   :  { %1645 = vmatpush1.bf16.msra.mxu1 %v2980_v17  ;;  %v3074_v17 = vld [vmem:[#allocation5 + $0x22c] ss:$16 sps:$4 sm:$0xff]  }
  0x96   :  { %1563 = vmatpush1.bf16.msra.mxu0 %v2977_v16  ;;  %1646 = vmatprep.subr.bf16.mxu1 %v2988_v19  ;;  %v3071_v16 = vld [vmem:[#allocation5 + $0x624] ss:$16 sps:$4 sm:$0xff]   ;;  %v3072_v19 = vld [vmem:[#allocation5 + $0x228] ss:$16 sps:$4 sm:$0xff]  }
  0x97   :  { %1564 = vmatprep.subr.bf16.mxu0 %v2985_v18  ;;  %v3069_v18 = vld [vmem:[#allocation5 + $0x620] ss:$16 sps:$4 sm:$0xff]  }
  0x99   :  { %1647 = vmatpush1.bf16.msra.mxu1 %v2986_v21  ;;  %v3080_v21 = vld [vmem:[#allocation5 + $0x24c] ss:$16 sps:$4 sm:$0xff]  }
  0x9a   :  { %1565 = vmatpush1.bf16.msra.mxu0 %v2983_v20  ;;  %1648 = vmatprep.subr.bf16.mxu1 %v2994_v23  ;;  %v3077_v20 = vld [vmem:[#allocation5 + $0x644] ss:$16 sps:$4 sm:$0xff]   ;;  %v3075_v23 = vld [vmem:[#allocation5 + $0x640] ss:$16 sps:$4 sm:$0xff]  }
  0x9b   :  { %1566 = vmatprep.subr.bf16.mxu0 %v2991_v22  ;;  %v3448_v22 = vmov 0  }
  0x9d   :  { %1649 = vmatpush1.bf16.msra.mxu1 %v2992_v25  ;;  %v3086_v25 = vld [vmem:[#allocation5 + $0x26c] ss:$16 sps:$4 sm:$0xff]  }
  0x9e   :  { %1567 = vmatpush1.bf16.msra.mxu0 %v2989_v24  ;;  %1650 = vmatprep.subr.bf16.mxu1 %v3000_v27  ;;  %v3078_v24 = vld [vmem:[#allocation5 + $0x248] ss:$16 sps:$4 sm:$0xff]  }
  0x9f   :  { %1568 = vmatprep.subr.bf16.mxu0 %v2997_v26  ;;  %v3081_v26 = vld [vmem:[#allocation5 + $0x660] ss:$16 sps:$4 sm:$0xff]   ;;  %v3084_v27 = vld [vmem:[#allocation5 + $0x268] ss:$16 sps:$4 sm:$0xff]  }
  0xa1   :  { %1651 = vmatpush1.bf16.msra.mxu1 %v2998_v29  ;;  %v3092_v29 = vld [vmem:[#allocation5 + $0x28c] ss:$16 sps:$4 sm:$0xff]  }
  0xa2   :  { %1569 = vmatpush1.bf16.msra.mxu0 %v2995_v28  ;;  %1652 = vmatprep.subr.bf16.mxu1 %v3006_v31  ;;  %v3089_v28 = vld [vmem:[#allocation5 + $0x684] ss:$16 sps:$4 sm:$0xff]  }
  0xa3   :  { %1570 = vmatprep.subr.bf16.mxu0 %v3003_v30  ;;  %v3087_v30 = vld [vmem:[#allocation5 + $0x680] ss:$16 sps:$4 sm:$0xff]   ;;  %v3095_v31 = vld [vmem:[#allocation5 + $0x6a4] ss:$16 sps:$4 sm:$0xff]  }
  0xa5   :  { %1653 = vmatpush1.bf16.msra.mxu1 %v3004_v35  ;;  %v3096_v35 = vld [vmem:[#allocation5 + $0x2a8] ss:$16 sps:$4 sm:$0xff]  }
  0xa6   :  { %1571 = vmatpush1.bf16.msra.mxu0 %v3001_v33  ;;  %1654 = vmatprep.subr.bf16.mxu1 %v3012_v37  ;;  %v3093_v33 = vld [vmem:[#allocation5 + $0x6a0] ss:$16 sps:$4 sm:$0xff]   ;;  %v3104_v37 = vld [vmem:[#allocation5 + $0x2cc] ss:$16 sps:$4 sm:$0xff]  }
  0xa7   :  { %1572 = vmatprep.subr.bf16.mxu0 %v3009_v36  ;;  %v3101_v36 = vld [vmem:[#allocation5 + $0x6c4] ss:$16 sps:$4 sm:$0xff]  }
  0xa9   :  { %1655 = vmatpush1.bf16.msra.mxu1 %v3010_v39  ;;  %v3102_v39 = vld [vmem:[#allocation5 + $0x2c8] ss:$16 sps:$4 sm:$0xff]  }
  0xaa   :  { %1573 = vmatpush1.bf16.msra.mxu0 %v3007_v38  ;;  %1656 = vmatprep.subr.bf16.mxu1 %v3018_v41  ;;  %v3099_v38 = vld [vmem:[#allocation5 + $0x6c0] ss:$16 sps:$4 sm:$0xff]   ;;  %v3110_v41 = vld [vmem:[#allocation5 + $0x2ec] ss:$16 sps:$4 sm:$0xff]  }
  0xab   :  { %1574 = vmatprep.subr.bf16.mxu0 %v3015_v40  ;;  %v3107_v40 = vld [vmem:[#allocation5 + $0x6e4] ss:$16 sps:$4 sm:$0xff]  }
  0xad   :  { %1657 = vmatpush1.bf16.msra.mxu1 %v3016_v43  ;;  %v3108_v43 = vld [vmem:[#allocation5 + $0x2e8] ss:$16 sps:$4 sm:$0xff]  }
  0xae   :  { %1575 = vmatpush1.bf16.msra.mxu0 %v3013_v42  ;;  %1658 = vmatprep.subr.bf16.mxu1 %v3024_v45  ;;  %v3105_v42 = vld [vmem:[#allocation5 + $0x6e0] ss:$16 sps:$4 sm:$0xff]   ;;  %v3566_v45 = vld [vmem:[#allocation2 + $0x18] ss:$0 sps:$4 sm:$0xff]  }
  0xaf   :  { %1576 = vmatprep.subr.bf16.mxu0 %v3021_v44  ;;  %v3114_v44 = vld [vmem:[#allocation5 + $0x30c] ss:$16 sps:$4 sm:$0xff]  }
  0xb1   :  { %1659 = vmatpush1.bf16.msra.mxu1 %v3022_v47  ;;  %v3117_v47 = vld [vmem:[#allocation5 + $0x32c] ss:$16 sps:$4 sm:$0xff]  }
  0xb2   :  { %1577 = vmatpush1.bf16.msra.mxu0 %v3019_v46  ;;  %1660 = vmatprep.subr.bf16.mxu1 %v3030_v49  ;;  %v3112_v46 = vld [vmem:[#allocation5 + $0x308] ss:$16 sps:$4 sm:$0xff]   ;;  %v3210_v49 = vld [vmem:[#allocation7 + $0x4] ss:$8 sps:$4 sm:$0xff]  }
  0xb3   :  { %1578 = vmatprep.subr.bf16.mxu0 %v3027_v48  ;;  %v3208_v48 = vld [vmem:[#allocation7] ss:$8 sps:$4 sm:$0xff]  }
  0xb5   :  { %1661 = vmatpush1.bf16.msra.mxu1 %v3028_v52  ;;  %v3213_v52 = vld [vmem:[#allocation7 + $0x14] ss:$8 sps:$4 sm:$0xff]  }
  0xb6   :  { %1579 = vmatpush1.bf16.msra.mxu0 %v3025_v50  ;;  %1662 = vmatprep.subr.bf16.mxu1 %v3036_v54  ;;  %v3115_v50 = vld [vmem:[#allocation5 + $0x328] ss:$16 sps:$4 sm:$0xff]  }
  0xb7   :  { %1580 = vmatprep.subr.bf16.mxu0 %v3033_v53  ;;  %v3120_v53 = vld [vmem:[#allocation5 + $0x34c] ss:$16 sps:$4 sm:$0xff]   ;;  %v3211_v54 = vld [vmem:[#allocation7 + $0x10] ss:$8 sps:$4 sm:$0xff]  }
  0xb9   :  { %1663 = vmatpush1.bf16.msra.mxu1 %v3034_v56  ;;  %v3118_v56 = vld [vmem:[#allocation5 + $0x348] ss:$16 sps:$4 sm:$0xff]  }
  0xba   :  { %1581 = vmatpush1.bf16.msra.mxu0 %v3031_v55  ;;  %1664 = vmatprep.subr.bf16.mxu1 %v3042_v58  ;;  %v3216_v55 = vld [vmem:[#allocation7 + $0x24] ss:$8 sps:$4 sm:$0xff]   ;;  %v3214_v58 = vld [vmem:[#allocation7 + $0x20] ss:$8 sps:$4 sm:$0xff]  }
  0xbb   :  { %1582 = vmatprep.subr.bf16.mxu0 %v3039_v57  ;;  %v3123_v57 = vld [vmem:[#allocation5 + $0x36c] ss:$16 sps:$4 sm:$0xff]  }
  0xbd   :  { %1665 = vmatpush1.bf16.msra.mxu1 %v3040_v60  ;;  %v3126_v60 = vld [vmem:[#allocation5 + $0x38c] ss:$16 sps:$4 sm:$0xff]  }
  0xbe   :  { %1583 = vmatpush1.bf16.msra.mxu0 %v3037_v59  ;;  %1666 = vmatprep.subr.bf16.mxu1 %v3048_v62  ;;  %v3121_v59 = vld [vmem:[#allocation5 + $0x368] ss:$16 sps:$4 sm:$0xff]  }
  0xbf   :  { %1584 = vmatprep.subr.bf16.mxu0 %v3045_v61  ;;  %v3219_v61 = vld [vmem:[#allocation7 + $0x34] ss:$8 sps:$4 sm:$0xff]   ;;  %v3217_v62 = vld [vmem:[#allocation7 + $0x30] ss:$8 sps:$4 sm:$0xff]  }
  0xc1   :  { %1667 = vmatpush1.bf16.msra.mxu1 %v3046_v0  ;;  %v3124_v0 = vld [vmem:[#allocation5 + $0x388] ss:$16 sps:$4 sm:$0xff]  }
  0xc2   :  { %1585 = vmatpush1.bf16.msra.mxu0 %v3043_v63  ;;  %1668 = vmatprep.subr.bf16.mxu1 %v3054_v2  ;;  %v3222_v63 = vld [vmem:[#allocation7 + $0x44] ss:$8 sps:$4 sm:$0xff]   ;;  %v3220_v2 = vld [vmem:[#allocation7 + $0x40] ss:$8 sps:$4 sm:$0xff]  }
  0xc3   :  { %1586 = vmatprep.subr.bf16.mxu0 %v3051_v1  ;;  %v3129_v1 = vld [vmem:[#allocation5 + $0x3ac] ss:$16 sps:$4 sm:$0xff]  }
  0xc5   :  { %1669 = vmatpush1.bf16.msra.mxu1 %v3052_v4  ;;  %v3127_v4 = vld [vmem:[#allocation5 + $0x3a8] ss:$16 sps:$4 sm:$0xff]  }
  0xc6   :  { %1587 = vmatpush1.bf16.msra.mxu0 %v3049_v3  ;;  %1670 = vmatprep.subr.bf16.mxu1 %v3060_v8  ;;  %v3225_v3 = vld [vmem:[#allocation7 + $0x54] ss:$8 sps:$4 sm:$0xff]   ;;  %v3223_v8 = vld [vmem:[#allocation7 + $0x50] ss:$8 sps:$4 sm:$0xff]  }
  0xc7   :  { %1588 = vmatprep.subr.bf16.mxu0 %v3057_v5  ;;  %v3132_v5 = vld [vmem:[#allocation5 + $0x3cc] ss:$16 sps:$4 sm:$0xff]  }
  0xc9   :  { %1671 = vmatpush1.bf16.msra.mxu1 %v3058_v10  ;;  %v3130_v10 = vld [vmem:[#allocation5 + $0x3c8] ss:$16 sps:$4 sm:$0xff]  }
  0xca   :  { %1589 = vmatpush1.bf16.msra.mxu0 %v3055_v9  ;;  %1681 = vmatprep.subr.bf16.mxu1 %v3068_v12  ;;  %v3228_v9 = vld [vmem:[#allocation7 + $0x64] ss:$8 sps:$4 sm:$0xff]   ;;  %v3226_v12 = vld [vmem:[#allocation7 + $0x60] ss:$8 sps:$4 sm:$0xff]  }
  0xcb   :  { %1599 = vmatprep.subr.bf16.mxu0 %v3065_v11  ;;  %v3135_v11 = vld [vmem:[#allocation5 + $0x3ec] ss:$16 sps:$4 sm:$0xff]  }
  0xcc   :  { %1673 = vmatmul.mubr.bf16.vlgmr.msra.gmra.mrb[4].mxu1 %v3544_v6  ;;  %v3083_v6 = vld [vmem:[#allocation5 + $0x664] ss:$16 sps:$4 sm:$0xff]  }
  0xcd   :  { %1591 = vmatmul.mubr.bf16.vlgmr.msra.gmra.mrb[0].mxu0 %v3560_v13  ;;  %1682 = vmatpush1.bf16.msra.mxu1 %v3066_v15  ;;  %v3133_v15 = vld [vmem:[#allocation5 + $0x3e8] ss:$16 sps:$4 sm:$0xff]  }
  0xce   :  { %1600 = vmatpush1.bf16.msra.mxu0 %v3063_v14  ;;  %1683 = vmatprep.subr.bf16.mxu1 %v3074_v17  ;;  %v3231_v14 = vld [vmem:[#allocation7 + $0x74] ss:$8 sps:$4 sm:$0xff]   ;;  %v3229_v17 = vld [vmem:[#allocation7 + $0x70] ss:$8 sps:$4 sm:$0xff]  }
  0xcf   :  { %1601 = vmatprep.subr.bf16.mxu0 %v3071_v16  ;;  %1631 = vmatprep.mubr.bf16.mxu0 %v3448_v22  ;;  %v3138_v16 = vld [vmem:[#allocation5 + $0x40c] ss:$16 sps:$4 sm:$0xff]  }
  0xd0   :  { %1713 = vmatprep.mubr.bf16.mxu1 %v3540_v51  ;;  %v3090_v51 = vld [vmem:[#allocation5 + $0x288] ss:$16 sps:$4 sm:$0xff]  }
  0xd1   :  { %1684 = vmatpush1.bf16.msra.mxu1 %v3072_v19  ;;  %v3136_v19 = vld [vmem:[#allocation5 + $0x408] ss:$16 sps:$4 sm:$0xff]  }
  0xd2   :  { %1602 = vmatpush1.bf16.msra.mxu0 %v3069_v18  ;;  %1685 = vmatprep.subr.bf16.mxu1 %v3080_v21  ;;  %v3234_v18 = vld [vmem:[#allocation7 + $0x84] ss:$8 sps:$4 sm:$0xff]   ;;  %v3232_v21 = vld [vmem:[#allocation7 + $0x80] ss:$8 sps:$4 sm:$0xff]  }
  0xd3   :  { %1603 = vmatprep.subr.bf16.mxu0 %v3077_v20  ;;  %v3141_v20 = vld [vmem:[#allocation5 + $0x42c] ss:$16 sps:$4 sm:$0xff]  }
  0xd5   :  { %1686 = vmatpush1.bf16.msra.mxu1 %v3078_v24  ;;  %v3139_v24 = vld [vmem:[#allocation5 + $0x428] ss:$16 sps:$4 sm:$0xff]  }
  0xd6   :  { %1604 = vmatpush1.bf16.msra.mxu0 %v3075_v23  ;;  %1687 = vmatprep.subr.bf16.mxu1 %v3086_v25  ;;  %v3237_v23 = vld [vmem:[#allocation7 + $0x94] ss:$8 sps:$4 sm:$0xff]   ;;  %v3235_v25 = vld [vmem:[#allocation7 + $0x90] ss:$8 sps:$4 sm:$0xff]  }
  0xd7   :  { %1605 = vmatprep.subr.bf16.mxu0 %v3083_v6  ;;  %v3144_v6 = vld [vmem:[#allocation5 + $0x44c] ss:$16 sps:$4 sm:$0xff]  }
  0xd9   :  { %1688 = vmatpush1.bf16.msra.mxu1 %v3084_v27  ;;  %v3142_v27 = vld [vmem:[#allocation5 + $0x448] ss:$16 sps:$4 sm:$0xff]  }
  0xda   :  { %1606 = vmatpush1.bf16.msra.mxu0 %v3081_v26  ;;  %1689 = vmatprep.subr.bf16.mxu1 %v3092_v29  ;;  %v3240_v26 = vld [vmem:[#allocation7 + $0xa4] ss:$8 sps:$4 sm:$0xff]   ;;  %v3238_v29 = vld [vmem:[#allocation7 + $0xa0] ss:$8 sps:$4 sm:$0xff]  }
  0xdb   :  { %1607 = vmatprep.subr.bf16.mxu0 %v3089_v28  ;;  %v3147_v28 = vld [vmem:[#allocation5 + $0x46c] ss:$16 sps:$4 sm:$0xff]  }
  0xdd   :  { %1690 = vmatpush1.bf16.msra.mxu1 %v3090_v51  ;;  %v3150_v51 = vld [vmem:[#allocation5 + $0x48c] ss:$16 sps:$4 sm:$0xff]  }
  0xde   :  { %1608 = vmatpush1.bf16.msra.mxu0 %v3087_v30  ;;  %1691 = vmatprep.subr.bf16.mxu1 %v3098_v32  ;;  %v3145_v30 = vld [vmem:[#allocation5 + $0x468] ss:$16 sps:$4 sm:$0xff]  }
  0xdf   :  { %1609 = vmatprep.subr.bf16.mxu0 %v3095_v31  ;;  %v3246_v31 = vld [vmem:[#allocation7 + $0xc4] ss:$8 sps:$4 sm:$0xff]   ;;  %v3148_v32 = vld [vmem:[#allocation5 + $0x488] ss:$16 sps:$4 sm:$0xff]  }
  0xe1   :  { %1692 = vmatpush1.bf16.msra.mxu1 %v3096_v35  ;;  %v3244_v35 = vld [vmem:[#allocation7 + $0xc0] ss:$8 sps:$4 sm:$0xff]  }
  0xe2   :  { %1610 = vmatpush1.bf16.msra.mxu0 %v3093_v33  ;;  %1693 = vmatprep.subr.bf16.mxu1 %v3104_v37  ;;  %v3153_v33 = vld [vmem:[#allocation5 + $0x4ac] ss:$16 sps:$4 sm:$0xff]   ;;  %v3151_v37 = vld [vmem:[#allocation5 + $0x4a8] ss:$16 sps:$4 sm:$0xff]  }
  0xe3   :  { %1611 = vmatprep.subr.bf16.mxu0 %v3101_v36  ;;  %v3249_v36 = vld [vmem:[#allocation7 + $0xd4] ss:$8 sps:$4 sm:$0xff]  }
  0xe5   :  { %1694 = vmatpush1.bf16.msra.mxu1 %v3102_v39  ;;  %v3247_v39 = vld [vmem:[#allocation7 + $0xd0] ss:$8 sps:$4 sm:$0xff]  }
  0xe6   :  { %1612 = vmatpush1.bf16.msra.mxu0 %v3099_v38  ;;  %1695 = vmatprep.subr.bf16.mxu1 %v3110_v41  ;;  %v3156_v38 = vld [vmem:[#allocation5 + $0x4cc] ss:$16 sps:$4 sm:$0xff]  }
  0xe7   :  { %1613 = vmatprep.subr.bf16.mxu0 %v3107_v40  ;;  %v3154_v40 = vld [vmem:[#allocation5 + $0x4c8] ss:$16 sps:$4 sm:$0xff]   ;;  %v3159_v41 = vld [vmem:[#allocation5 + $0x4ec] ss:$16 sps:$4 sm:$0xff]  }
  0xe9   :  { %1696 = vmatpush1.bf16.msra.mxu1 %v3108_v43  ;;  %v3162_v43 = vld [vmem:[#allocation5 + $0x50c] ss:$16 sps:$4 sm:$0xff]  }
  0xea   :  { %1614 = vmatpush1.bf16.msra.mxu0 %v3105_v42  ;;  %1697 = vmatprep.subr.bf16.mxu1 %v3114_v44  ;;  %v3157_v42 = vld [vmem:[#allocation5 + $0x4e8] ss:$16 sps:$4 sm:$0xff]  }
  0xeb   :  { %2208 = vmatprep.subr.bf16.mxu0 %v3210_v49  ;;  %v3160_v44 = vld [vmem:[#allocation5 + $0x508] ss:$16 sps:$4 sm:$0xff]  }
  0xec   :  { %v3166_v49 = vld [vmem:[#allocation5 + $0x548] ss:$16 sps:$4 sm:$0xff]  }
  0xed   :  { %1632 = vmatmul.mubr.bf16.vlgmr.msra.gmra.mrb[0].mxu0 %v3566_v45  ;;  %1698 = vmatpush1.bf16.msra.mxu1 %v3112_v46  ;;  %v3165_v46 = vld [vmem:[#allocation5 + $0x52c] ss:$16 sps:$4 sm:$0xff]  }
  0xee   :  { %1699 = vmatprep.subr.bf16.mxu1 %v3117_v47  ;;  %2209 = vmatpush1.bf16.msra.mxu0 %v3208_v48  ;;  %v3163_v47 = vld [vmem:[#allocation5 + $0x528] ss:$16 sps:$4 sm:$0xff]   ;;  %v3168_v48 = vld [vmem:[#allocation5 + $0x54c] ss:$16 sps:$4 sm:$0xff]  }
  0xef   :  { %2210 = vmatprep.subr.bf16.mxu0 %v3213_v52  ;;  %v3169_v52 = vld [vmem:[#allocation5 + $0x568] ss:$16 sps:$4 sm:$0xff]  }
  0xf1   :  { %1700 = vmatpush1.bf16.msra.mxu1 %v3115_v50  ;;  %v3171_v50 = vld [vmem:[#allocation5 + $0x56c] ss:$16 sps:$4 sm:$0xff]  }
  0xf2   :  { %1701 = vmatprep.subr.bf16.mxu1 %v3120_v53  ;;  %2211 = vmatpush1.bf16.msra.mxu0 %v3211_v54  ;;  %v3174_v53 = vld [vmem:[#allocation5 + $0x58c] ss:$16 sps:$4 sm:$0xff]   ;;  %v3172_v54 = vld [vmem:[#allocation5 + $0x588] ss:$16 sps:$4 sm:$0xff]  }
  0xf3   :  { %2212 = vmatprep.subr.bf16.mxu0 %v3216_v55  ;;  %v3177_v55 = vld [vmem:[#allocation5 + $0x5ac] ss:$16 sps:$4 sm:$0xff]  }
  0xf5   :  { %1702 = vmatpush1.bf16.msra.mxu1 %v3118_v56  ;;  %v3175_v56 = vld [vmem:[#allocation5 + $0x5a8] ss:$16 sps:$4 sm:$0xff]  }
  0xf6   :  { %1703 = vmatprep.subr.bf16.mxu1 %v3123_v57  ;;  %2213 = vmatpush1.bf16.msra.mxu0 %v3214_v58  ;;  %v3180_v57 = vld [vmem:[#allocation5 + $0x5cc] ss:$16 sps:$4 sm:$0xff]  }
  0xf7   :  { %2214 = vmatprep.subr.bf16.mxu0 %v3219_v61  ;;  %v3252_v58 = vld [vmem:[#allocation7 + $0xe4] ss:$8 sps:$4 sm:$0xff]  }
  0xf8   :  { %v3183_v61 = vld [vmem:[#allocation5 + $0x5ec] ss:$16 sps:$4 sm:$0xff]  }
  0xf9   :  { %1704 = vmatpush1.bf16.msra.mxu1 %v3121_v59  ;;  %v3250_v59 = vld [vmem:[#allocation7 + $0xe0] ss:$8 sps:$4 sm:$0xff]  }
  0xfa   :  { %1705 = vmatprep.subr.bf16.mxu1 %v3126_v60  ;;  %2215 = vmatpush1.bf16.msra.mxu0 %v3217_v62  ;;  %v3178_v60 = vld [vmem:[#allocation5 + $0x5c8] ss:$16 sps:$4 sm:$0xff]   ;;  %v3255_v62 = vld [vmem:[#allocation7 + $0xf4] ss:$8 sps:$4 sm:$0xff]  }
  0xfb   :  { %2216 = vmatprep.subr.bf16.mxu0 %v3222_v63  ;;  %v3253_v63 = vld [vmem:[#allocation7 + $0xf0] ss:$8 sps:$4 sm:$0xff]  }
  0xfd   :  { %1706 = vmatpush1.bf16.msra.mxu1 %v3124_v0  ;;  %v3181_v0 = vld [vmem:[#allocation5 + $0x5e8] ss:$16 sps:$4 sm:$0xff]  }
  0xfe   :  { %1707 = vmatprep.subr.bf16.mxu1 %v3129_v1  ;;  %2217 = vmatpush1.bf16.msra.mxu0 %v3220_v2  ;;  %v3186_v1 = vld [vmem:[#allocation5 + $0x60c] ss:$16 sps:$4 sm:$0xff]  }
  0xff   :  { %2218 = vmatprep.subr.bf16.mxu0 %v3225_v3  ;;  %v3258_v2 = vld [vmem:[#allocation7 + $0x104] ss:$8 sps:$4 sm:$0xff]   ;;  %v3184_v3 = vld [vmem:[#allocation5 + $0x608] ss:$16 sps:$4 sm:$0xff]  }
 0x101   :  { %1708 = vmatpush1.bf16.msra.mxu1 %v3127_v4  ;;  %v3189_v4 = vld [vmem:[#allocation5 + $0x62c] ss:$16 sps:$4 sm:$0xff]  }
 0x102   :  { %1709 = vmatprep.subr.bf16.mxu1 %v3132_v5  ;;  %2219 = vmatpush1.bf16.msra.mxu0 %v3223_v8  ;;  %v3187_v5 = vld [vmem:[#allocation5 + $0x628] ss:$16 sps:$4 sm:$0xff]   ;;  %v3192_v8 = vld [vmem:[#allocation5 + $0x64c] ss:$16 sps:$4 sm:$0xff]  }
 0x103   :  { %2220 = vmatprep.subr.bf16.mxu0 %v3228_v9  ;;  %v3190_v9 = vld [vmem:[#allocation5 + $0x648] ss:$16 sps:$4 sm:$0xff]  }
 0x105   :  { %1710 = vmatpush1.bf16.msra.mxu1 %v3130_v10  ;;  %v3195_v10 = vld [vmem:[#allocation5 + $0x66c] ss:$16 sps:$4 sm:$0xff]  }
 0x106   :  { %1711 = vmatprep.subr.bf16.mxu1 %v3135_v11  ;;  %2221 = vmatpush1.bf16.msra.mxu0 %v3226_v12  ;;  %v3193_v11 = vld [vmem:[#allocation5 + $0x668] ss:$16 sps:$4 sm:$0xff]   ;;  %v3198_v12 = vld [vmem:[#allocation5 + $0x68c] ss:$16 sps:$4 sm:$0xff]  }
 0x107   :  { %2222 = vmatprep.subr.bf16.mxu0 %v3231_v14  ;;  %v3196_v14 = vld [vmem:[#allocation5 + $0x688] ss:$16 sps:$4 sm:$0xff]  }
 0x109   :  { %1712 = vmatpush1.bf16.msra.mxu1 %v3133_v15  ;;  %v3201_v15 = vld [vmem:[#allocation5 + $0x6ac] ss:$16 sps:$4 sm:$0xff]  }
 0x10a   :  { %1722 = vmatprep.subr.bf16.mxu1 %v3138_v16  ;;  %2223 = vmatpush1.bf16.msra.mxu0 %v3229_v17  ;;  %v3204_v16 = vld [vmem:[#allocation5 + $0x6cc] ss:$16 sps:$4 sm:$0xff]  }
 0x10b   :  { %2224 = vmatprep.subr.bf16.mxu0 %v3234_v18 }
 0x10c   :  { %1714 = vmatmul.mubr.bf16.vlgmr.msra.gmra.mrb[4].mxu1 %v3546_v7  ;;  %v3243_v7 = vld [vmem:[#allocation7 + $0xb4] ss:$8 sps:$4 sm:$0xff]  }
 0x10d   :  { %1723 = vmatpush1.bf16.msra.mxu1 %v3136_v19  ;;  %1754 = vmatprep.mubr.bf16.mxu1 %v3555_v34  ;;  %v3241_v34 = vld [vmem:[#allocation7 + $0xb0] ss:$8 sps:$4 sm:$0xff]  }
 0x10e   :  { %1724 = vmatprep.subr.bf16.mxu1 %v3141_v20  ;;  %2225 = vmatpush1.bf16.msra.mxu0 %v3232_v21  ;;  %v3202_v19 = vld [vmem:[#allocation5 + $0x6c8] ss:$16 sps:$4 sm:$0xff]   ;;  %v3207_v21 = vld [vmem:[#allocation5 + $0x6ec] ss:$16 sps:$4 sm:$0xff]  }
 0x10f   :  { %2226 = vmatprep.subr.bf16.mxu0 %v3237_v23  ;;  %v3205_v23 = vld [vmem:[#allocation5 + $0x6e8] ss:$16 sps:$4 sm:$0xff]  }
 0x111   :  { %1725 = vmatpush1.bf16.msra.mxu1 %v3139_v24  ;;  %v311_v24 = vlaneseq }
 0x112   :  { %1726 = vmatprep.subr.bf16.mxu1 %v3144_v6  ;;  %2227 = vmatpush1.bf16.msra.mxu0 %v3235_v25 }
 0x113   :  { %2228 = vmatprep.subr.bf16.mxu0 %v3240_v26  ;;  %v3574_v6 = vshrl.u32 %v311_v24, 7  ;;  %v3580_v26 = vld [vmem:[%s3617_s2] sm:$0xf] }
 0x115   :  { %1727 = vmatpush1.bf16.msra.mxu1 %v3142_v27  ;;  %v313_v25 = vsub.s32 0, %v3574_v6  ;;  %v317_v27 = vsub.s32 1, %v3574_v6 }
 0x116   :  { %1728 = vmatprep.subr.bf16.mxu1 %v3147_v28  ;;  %2229 = vmatpush1.bf16.msra.mxu0 %v3238_v29 }
 0x117   :  { %2230 = vmatprep.subr.bf16.mxu0 %v3243_v7  ;;  %v314_v28 = vrot.slane %v3580_v26, %v313_v25 }
 0x119   :  { %1729 = vmatpush1.bf16.msra.mxu1 %v3145_v30 }
 0x11a   :  { %1730 = vmatprep.subr.bf16.mxu1 %v3150_v51  ;;  %2231 = vmatpush1.bf16.msra.mxu0 %v3241_v34 }
 0x11b   :  { %2232 = vmatprep.subr.bf16.mxu0 %v3246_v31 }
 0x11d   :  { %1731 = vmatpush1.bf16.msra.mxu1 %v3148_v32 }
 0x11e   :  { %1732 = vmatprep.subr.bf16.mxu1 %v3153_v33  ;;  %2233 = vmatpush1.bf16.msra.mxu0 %v3244_v35 }
 0x11f   :  { %2234 = vmatprep.subr.bf16.mxu0 %v3249_v36 }
 0x121   :  { %1733 = vmatpush1.bf16.msra.mxu1 %v3151_v37 }
 0x122   :  { %1734 = vmatprep.subr.bf16.mxu1 %v3156_v38  ;;  %2235 = vmatpush1.bf16.msra.mxu0 %v3247_v39  ;;  %v3256_v38 = vld [vmem:[#allocation7 + $0x100] ss:$8 sps:$4 sm:$0xff]  }
 0x123   :  { %2236 = vmatprep.subr.bf16.mxu0 %v3252_v58  ;;  %v3268_v58 = vld [vmem:[#allocation7 + $0x140] ss:$8 sps:$4 sm:$0xff]  }
 0x125   :  { %1735 = vmatpush1.bf16.msra.mxu1 %v3154_v40  ;;  %v3261_v40 = vld [vmem:[#allocation7 + $0x114] ss:$8 sps:$4 sm:$0xff]  }
 0x126   :  { %1736 = vmatprep.subr.bf16.mxu1 %v3159_v41  ;;  %2237 = vmatpush1.bf16.msra.mxu0 %v3250_v59  ;;  %v3304_v41 = vld [vmem:[#allocation8 + $0x40] sm:$0xff]   ;;  %v3273_v59 = vld [vmem:[#allocation7 + $0x154] ss:$8 sps:$4 sm:$0xff]  }
 0x127   :  { %2238 = vmatprep.subr.bf16.mxu0 %v3255_v62  ;;  %v3271_v62 = vld [vmem:[#allocation7 + $0x150] ss:$8 sps:$4 sm:$0xff]  }
 0x129   :  { %1737 = vmatpush1.bf16.msra.mxu1 %v3157_v42  ;;  %v3305_v42 = vld [vmem:[#allocation8] sm:$0xff]  }
 0x12a   :  { %1738 = vmatprep.subr.bf16.mxu1 %v3162_v43  ;;  %2239 = vmatpush1.bf16.msra.mxu0 %v3253_v63  ;;  %v3306_v43 = vld [vmem:[#allocation8 + $0x48] sm:$0xff]  }
 0x12b   :  { %2249 = vmatprep.subr.bf16.mxu0 %v3258_v2  ;;  %v3276_v63 = vld [vmem:[#allocation7 + $0x164] ss:$8 sps:$4 sm:$0xff]   ;;  %v3279_v2 = vld [vmem:[#allocation7 + $0x174] ss:$8 sps:$4 sm:$0xff]  }
 0x12d   :  { %1739 = vmatpush1.bf16.msra.mxu1 %v3160_v44  ;;  %v3259_v44 = vld [vmem:[#allocation7 + $0x110] ss:$8 sps:$4 sm:$0xff]  }
 0x12e   :  { %1740 = vmatprep.subr.bf16.mxu1 %v3165_v46  ;;  %v3264_v46 = vld [vmem:[#allocation7 + $0x124] ss:$8 sps:$4 sm:$0xff]  }
 0x131   :  { %1741 = vmatpush1.bf16.msra.mxu1 %v3163_v47  ;;  %v3307_v47 = vld [vmem:[#allocation8 + $0x8] sm:$0xff]  }
 0x132   :  { %1742 = vmatprep.subr.bf16.mxu1 %v3168_v48  ;;  %v3308_v48 = vld [vmem:[#allocation8 + $0x50] sm:$0xff]  }
 0x135   :  { %1743 = vmatpush1.bf16.msra.mxu1 %v3166_v49  ;;  %v3262_v49 = vld [vmem:[#allocation7 + $0x120] ss:$8 sps:$4 sm:$0xff]  }
 0x136   :  { %1744 = vmatprep.subr.bf16.mxu1 %v3171_v50  ;;  %v3267_v50 = vld [vmem:[#allocation7 + $0x134] ss:$8 sps:$4 sm:$0xff]  }
 0x139   :  { %1745 = vmatpush1.bf16.msra.mxu1 %v3169_v52  ;;  %v3309_v52 = vld [vmem:[#allocation8 + $0x10] sm:$0xff]  }
 0x13a   :  { %1746 = vmatprep.subr.bf16.mxu1 %v3174_v53  ;;  %v3310_v53 = vld [vmem:[#allocation8 + $0x58] sm:$0xff]  }
 0x13d   :  { %1747 = vmatpush1.bf16.msra.mxu1 %v3172_v54  ;;  %v3265_v54 = vld [vmem:[#allocation7 + $0x130] ss:$8 sps:$4 sm:$0xff]  }
 0x13e   :  { %1748 = vmatprep.subr.bf16.mxu1 %v3177_v55  ;;  %v3270_v55 = vld [vmem:[#allocation7 + $0x144] ss:$8 sps:$4 sm:$0xff]  }
 0x141   :  { %1749 = vmatpush1.bf16.msra.mxu1 %v3175_v56  ;;  %v3311_v56 = vld [vmem:[#allocation8 + $0x18] sm:$0xff]  }
 0x142   :  { %1750 = vmatprep.subr.bf16.mxu1 %v3180_v57  ;;  %v3312_v57 = vld [vmem:[#allocation8 + $0x60] sm:$0xff]  }
 0x145   :  { %1751 = vmatpush1.bf16.msra.mxu1 %v3178_v60  ;;  %v3313_v60 = vld [vmem:[#allocation8 + $0x20] sm:$0xff]  }
 0x146   :  { %1752 = vmatprep.subr.bf16.mxu1 %v3183_v61  ;;  %v3314_v61 = vld [vmem:[#allocation8 + $0x68] sm:$0xff]  }
 0x149   :  { %1753 = vmatpush1.bf16.msra.mxu1 %v3181_v0  ;;  %v3315_v0 = vld [vmem:[#allocation8 + $0x28] sm:$0xff]  }
 0x14a   :  { %1763 = vmatprep.subr.bf16.mxu1 %v3186_v1  ;;  %v3274_v1 = vld [vmem:[#allocation7 + $0x160] ss:$8 sps:$4 sm:$0xff]  }
 0x14c   :  { %1755 = vmatmul.mubr.bf16.vlgmr.msra.gmra.mrb[4].mxu1 %v3560_v13  ;;  %v3199_v13 = vld [vmem:[#allocation5 + $0x6a8] ss:$16 sps:$4 sm:$0xff]  }
 0x14d   :  { %1764 = vmatpush1.bf16.msra.mxu1 %v3184_v3  ;;  %1795 = vmatprep.mubr.bf16.mxu1 %v3448_v22  ;;  %v3277_v3 = vld [vmem:[#allocation7 + $0x170] ss:$8 sps:$4 sm:$0xff]  }
 0x14e   :  { %1765 = vmatprep.subr.bf16.mxu1 %v3189_v4  ;;  %v3282_v4 = vld [vmem:[#allocation7 + $0x184] ss:$8 sps:$4 sm:$0xff]  }
 0x151   :  { %1766 = vmatpush1.bf16.msra.mxu1 %v3187_v5  ;;  %v3280_v5 = vld [vmem:[#allocation7 + $0x180] ss:$8 sps:$4 sm:$0xff]  }
 0x152   :  { %1767 = vmatprep.subr.bf16.mxu1 %v3192_v8  ;;  %v3285_v8 = vld [vmem:[#allocation7 + $0x194] ss:$8 sps:$4 sm:$0xff]  }
 0x155   :  { %1768 = vmatpush1.bf16.msra.mxu1 %v3190_v9  ;;  %v3283_v9 = vld [vmem:[#allocation7 + $0x190] ss:$8 sps:$4 sm:$0xff]  }
 0x156   :  { %1769 = vmatprep.subr.bf16.mxu1 %v3195_v10  ;;  %v3288_v10 = vld [vmem:[#allocation7 + $0x1a4] ss:$8 sps:$4 sm:$0xff]  }
 0x159   :  { %1770 = vmatpush1.bf16.msra.mxu1 %v3193_v11  ;;  %v3286_v11 = vld [vmem:[#allocation7 + $0x1a0] ss:$8 sps:$4 sm:$0xff]  }
 0x15a   :  { %1771 = vmatprep.subr.bf16.mxu1 %v3198_v12  ;;  %v3291_v12 = vld [vmem:[#allocation7 + $0x1b4] ss:$8 sps:$4 sm:$0xff]  }
 0x15d   :  { %1772 = vmatpush1.bf16.msra.mxu1 %v3196_v14  ;;  %v3289_v14 = vld [vmem:[#allocation7 + $0x1b0] ss:$8 sps:$4 sm:$0xff]  }
 0x15e   :  { %1773 = vmatprep.subr.bf16.mxu1 %v3201_v15  ;;  %v3294_v15 = vld [vmem:[#allocation7 + $0x1c4] ss:$8 sps:$4 sm:$0xff]  }
 0x15f   :  { %v1510_v17 = vpop.f32.mrb[0].mxu1 }
 0x160   :  { %v1512_v22 = vpop.f32.mrb[1].mxu1  ;;  %v1511_v29 = vadd.f32 %v1510_v17, %v314_v28  ;;  %v3295_v17 = vld [vmem:[#allocation7 + $0x1d0] ss:$8 sps:$4 sm:$0xff]  }
 0x161   :  { %v1514_v18 = vpop.f32.mrb[2].mxu1  ;;  %1774 = vmatpush1.bf16.msra.mxu1 %v3199_v13  ;;  %v3292_v13 = vld [vmem:[#allocation7 + $0x1c0] ss:$8 sps:$4 sm:$0xff]  }
 0x162   :  { %v1515_v20 = vpop.f32.mrb[3].mxu1  ;;  %1775 = vmatprep.subr.bf16.mxu1 %v3204_v16  ;;  %v3297_v16 = vld [vmem:[#allocation7 + $0x1d4] ss:$8 sps:$4 sm:$0xff]   ;;  %v3298_v18 = vld [vmem:[#allocation7 + $0x1e0] ss:$8 sps:$4 sm:$0xff]  }
 0x163   :  { %v3301_v20 = vld [vmem:[#allocation7 + $0x1f0] ss:$8 sps:$4 sm:$0xff]  }
 0x165   :  { %1776 = vmatpush1.bf16.msra.mxu1 %v3202_v19  ;;  %v3303_v19 = vld [vmem:[#allocation7 + $0x1f4] ss:$8 sps:$4 sm:$0xff]  }
 0x166   :  { %1777 = vmatprep.subr.bf16.mxu1 %v3207_v21  ;;  %v321_v21 = vsub.s32 2, %v3574_v6 }
 0x168   :  { %v322_v24 = vrot.slane %v3580_v26, %v321_v21 }
 0x169   :  { %1778 = vmatpush1.bf16.msra.mxu1 %v3205_v23  ;;  %v325_v23 = vsub.s32 3, %v3574_v6 }
 0x16a   :  { %2799 = vmatprep.subr.bf16.mxu1 %v3304_v41 }
 0x16b   :  { %v326_v28 = vrot.slane %v3580_v26, %v325_v23 }
 0x16c   :  { %1796 = vmatmul.mubr.bf16.vlgmr.msra.gmra.mrb[4].mxu1 %v3566_v45  ;;  %v318_v45 = vrot.slane %v3580_v26, %v317_v27  ;;  %v1876_v26 = vld [vmem:[%s3619_s4] sm:$0x3] }
 0x16d   :  { %2800 = vmatpush3.bf16.msra.mxu1 %v3305_v42  ;;  %v1885_v41 = vrot.slane %v1876_v26, %v317_v27 }
 0x16e   :  { %v1513_v7 = vadd.f32 %v1512_v22, %v318_v45  ;;  %2801 = vmatprep.subr.bf16.mxu1 %v3306_v43  ;;  %v3300_v22 = vld [vmem:[#allocation7 + $0x1e4] ss:$8 sps:$4 sm:$0xff]  }
 0x171   :  { %2802 = vmatpush3.bf16.msra.mxu1 %v3307_v47 }
 0x172   :  { %2803 = vmatprep.subr.bf16.mxu1 %v3308_v48 }
 0x175   :  { %2804 = vmatpush3.bf16.msra.mxu1 %v3309_v52 }
 0x176   :  { %2805 = vmatprep.subr.bf16.mxu1 %v3310_v53 }
 0x179   :  { %2806 = vmatpush3.bf16.msra.mxu1 %v3311_v56 }
 0x17a   :  { %2807 = vmatprep.subr.bf16.mxu1 %v3312_v57 }
 0x17d   :  { %2808 = vmatpush3.bf16.msra.mxu1 %v3313_v60 }
 0x17e   :  { %2809 = vmatprep.subr.bf16.mxu1 %v3314_v61 }
 0x181   :  { %2810 = vmatpush3.bf16.msra.mxu1 %v3315_v0 }
 0x1c0   :  { %v1633_v30 = vpop.f32.mrb[0].mxu0 }
 0x1c1   :  { %v2822_v51 = vadd.f32 %v1633_v30, %v1511_v29  ;;  %v1635_v34 = vpop.f32.mrb[1].mxu0 }
 0x1c2   :  { %v2824_v31 = vadd.f32 %v1635_v34, %v1513_v7  ;;  %v1637_v32 = vpop.f32.mrb[2].mxu0 }
 0x1c3   :  { %v1804_v33 = vmax.f32 %v2822_v51, 0.0  ;;  %v1638_v35 = vpop.f32.mrb[3].mxu0 }
 0x1c4   :  { %v1805_v36 = vmax.f32 %v2824_v31, 0.0 }
 0x1c5   :  { %v1808_v39 = vpack.c.bf16 %v1804_v33, %v1804_v33 }
 0x1c6   :  { %v1809_v37 = vpack.c.bf16 %v1805_v36, %v1805_v36  ;;  %v3316_v36 = vld [vmem:[#allocation8 + $0x70] sm:$0xff]  }
 0x1c7   :  { %2811 = vmatprep.subr.bf16.mxu1 %v3316_v36 }
 0x1c8   :  { %2240 = vmatprep.mubr.bf16.mxu0 %v1809_v37  ;;  %v3317_v37 = vld [vmem:[#allocation8 + $0x30] sm:$0xff]  }
 0x1c9   :  { %2241 = vmatmul.mubr.bf16.vlgmr.msra.gmra.mrb[4].mxu0 %v1808_v39  ;;  %2812 = vmatpush3.bf16.msra.mxu1 %v3317_v37  ;;  %v3319_v39 = vld [vmem:[#allocation8 + $0x38] sm:$0xff]  }
 0x1ca   :  { %2250 = vmatpush1.bf16.msra.mxu0 %v3256_v38  ;;  %v3318_v38 = vld [vmem:[#allocation8 + $0x78] sm:$0xff]  }
 0x1cb   :  { %2251 = vmatprep.subr.bf16.mxu0 %v3261_v40  ;;  %2813 = vmatprep.subr.bf16.mxu1 %v3318_v38  ;;  %v1881_v40 = vrot.slane %v1876_v26, %v313_v25  ;;  %v2782_v25 = vld [vmem:[%s3621_s6] ss:$0 sm:$0xff] }
 0x1cd   :  { %2814 = vmatpush3.bf16.msra.mxu1 %v3319_v39 }
 0x1ce   :  { %2252 = vmatpush1.bf16.msra.mxu0 %v3259_v44 }
 0x1cf   :  { %2253 = vmatprep.subr.bf16.mxu0 %v3264_v46 }
 0x1d2   :  { %2254 = vmatpush1.bf16.msra.mxu0 %v3262_v49 }
 0x1d3   :  { %2255 = vmatprep.subr.bf16.mxu0 %v3267_v50 }
 0x1d6   :  { %2256 = vmatpush1.bf16.msra.mxu0 %v3265_v54 }
 0x1d7   :  { %2257 = vmatprep.subr.bf16.mxu0 %v3270_v55 }
 0x1da   :  { %2258 = vmatpush1.bf16.msra.mxu0 %v3268_v58 }
 0x1db   :  { %2259 = vmatprep.subr.bf16.mxu0 %v3273_v59 }
 0x1de   :  { %2260 = vmatpush1.bf16.msra.mxu0 %v3271_v62 }
 0x1df   :  { %2261 = vmatprep.subr.bf16.mxu0 %v3276_v63 }
 0x1e2   :  { %2262 = vmatpush1.bf16.msra.mxu0 %v3274_v1 }
 0x1e3   :  { %2263 = vmatprep.subr.bf16.mxu0 %v3279_v2 }
 0x1e6   :  { %2264 = vmatpush1.bf16.msra.mxu0 %v3277_v3 }
 0x1e7   :  { %2265 = vmatprep.subr.bf16.mxu0 %v3282_v4 }
 0x1ea   :  { %2266 = vmatpush1.bf16.msra.mxu0 %v3280_v5 }
 0x1eb   :  { %2267 = vmatprep.subr.bf16.mxu0 %v3285_v8 }
 0x1ee   :  { %2268 = vmatpush1.bf16.msra.mxu0 %v3283_v9 }
 0x1ef   :  { %2269 = vmatprep.subr.bf16.mxu0 %v3288_v10 }
 0x1f2   :  { %2270 = vmatpush1.bf16.msra.mxu0 %v3286_v11 }
 0x1f3   :  { %2271 = vmatprep.subr.bf16.mxu0 %v3291_v12 }
 0x1f6   :  { %2272 = vmatpush1.bf16.msra.mxu0 %v3289_v14 }
 0x1f7   :  { %2273 = vmatprep.subr.bf16.mxu0 %v3294_v15 }
 0x1fa   :  { %2274 = vmatpush1.bf16.msra.mxu0 %v3292_v13 }
 0x1fb   :  { %2275 = vmatprep.subr.bf16.mxu0 %v3297_v16 }
 0x1fe   :  { %2276 = vmatpush1.bf16.msra.mxu0 %v3295_v17 }
 0x1ff   :  { %2277 = vmatprep.subr.bf16.mxu0 %v3300_v22 }
 0x202   :  { %2278 = vmatpush1.bf16.msra.mxu0 %v3298_v18 }
 0x203   :  { %2279 = vmatprep.subr.bf16.mxu0 %v3303_v19 }
 0x206   :  { %2280 = vmatpush1.bf16.msra.mxu0 %v3301_v20 }
 0x23f   :  { %v1797_v45 = vpop.f32.mrb[4].mxu1 }
 0x240   :  { %v2825_v29 = vadd.f32 %v1797_v45, %v322_v24  ;;  %v1799_v7 = vpop.f32.mrb[5].mxu1 }
 0x241   :  { %v2826_v30 = vadd.f32 %v1799_v7, %v326_v28  ;;  %v1801_v51 = vpop.f32.mrb[6].mxu1 }
 0x242   :  { %v1806_v34 = vmax.f32 %v2825_v29, 0.0  ;;  %v1802_v31 = vpop.f32.mrb[7].mxu1 }
 0x243   :  { %v1807_v32 = vmax.f32 %v2826_v30, 0.0 }
 0x244   :  { %v1810_v35 = vpack.c.bf16 %v1806_v34, %v1806_v34 }
 0x245   :  { %v1811_v33 = vpack.c.bf16 %v1807_v32, %v1807_v32 }
 0x247   :  { %2281 = vmatprep.mubr.bf16.mxu0 %v1811_v33 }
 0x248   :  { %2282 = vmatmul.mubr.bf16.vlgmr.msra.gmra.mrb[4].mxu0 %v1810_v35 }
 0x31b   :  { %v2283_v42 = vpop.f32.mrb[4].mxu0 }
 0x31c   :  { %v2827_v43 = vadd.f32 %v2283_v42, %v1881_v40  ;;  %v2285_v44 = vpop.f32.mrb[5].mxu0 }
 0x31d   :  { %v2828_v46 = vadd.f32 %v2285_v44, %v1885_v41  ;;  %v2287_v47 = vpop.f32.mrb[6].mxu0 }
 0x31e   :  { %v2290_v48 = vmax.f32 %v2827_v43, 0.0  ;;  %v2288_v49 = vpop.f32.mrb[7].mxu0 }
 0x31f   :  { %v2291_v50 = vmax.f32 %v2828_v46, 0.0 }
 0x320   :  { %v2292_v53 = vpack.c.bf16 %v2290_v48, %v2290_v48 }
 0x321   :  { %v2293_v52 = vpack.c.bf16 %v2291_v50, %v2291_v50 }
 0x323   :  { %2461 = vmatprep.mubr.bf16.mxu1 %v2293_v52 }
 0x324   :  { %2462 = vmatmul.mubr.bf16.vlgmr.msra.gmra.mrb[8].mxu1 %v2292_v53 }
 0x3f7   :  { %v2815_v54 = vpop.f32.mrb[8].mxu1 }
 0x3f8   :  { %v2816_v55 = vpop.f32.mrb[9].mxu1 }
 0x3f9   :  { %v2817_v6 = vadd.f32 %v2816_v55, %v2815_v54  ;;  %v2818_v27 = vpop.f32.mrb[10].mxu1 }
 0x3fa   :  { %v2819_v56 = vpop.f32.mrb[11].mxu1 }
 0x3fb   :  { %v2464_v57 = vadd.f32 %v2817_v6, %v2782_v25 }
 0x3fd   :  { %2469 = vst [vmem:[#allocation10] sm:$0xff] %v2464_v57 }
 0x3fe   :  { %3419 = shalt.err (!%p3416_p8)
}
 0x3ff   :  { %s3420_s6 = scalar_lea.hbm %s3622_s7, 128 }
 0x400   :  { %p3421_p9 = scmp.ne.s32.totalorder %s3622_s7, %s3420_s6  ;;  %p3424_p10 = scmp.lt.u32.totalorder %s3420_s6, %s3622_s7 }
 0x402   :  { %p3426_p11 = pnand %p3424_p10, %p3421_p9 }
 0x404   :  { %3429 = shalt.err (!%p3426_p11)
}
 0x405   :  { %2479 = dma.vmem_to_hbm [thread:$0]  %s2477_s9, 128, %s3622_s7, [#allocation4]  }
 0x406   :  { %3436 = dma.done.wait [#allocation4], 128  }
 0x407   :  { %3437 = vsyncadd [#allocation4], 4294967168 }
 0x408   :  { %2483 = vsyncpa [#allocation3], 1 }
 0x409   :  { %2484 = vsyncpa [#allocation6], 1 }
 0x40a   :  { %2485 = vsyncpa [#allocation9], 1 }
 0x40b   :  { %2486 = vsyncpa [#allocation4], 1 }

</bundles_post_ra>
